<compile_context>
chip_gen: v7x
topology: tpu7x:2x2x1
jax: 0.10.0
libtpu: 0.0.40
codegen_flags: <defaults>
</compile_context>

<pallas_src>
import math
import functools

import jax
import jax.numpy as jnp
from jax.experimental import pallas as pl
from jax.experimental.pallas import tpu as pltpu


# ----------------------------- kernel --------------------------------------


def _layernorm(x, w, b, eps=1e-5):
    # x: (N, E) f32, w/b: (1, E) f32  -> (N, E) f32
    mu = jnp.mean(x, axis=-1, keepdims=True)
    var = jnp.mean((x - mu) ** 2, axis=-1, keepdims=True)
    return (x - mu) * jax.lax.rsqrt(var + eps) * w + b


def encoder_stack_kernel(
    x_ref,                         # (B, S, E)   f32  input activations (layer 0 seed)
    in_wt_ref, in_b_ref,           # (1, E, 3E) bf16, (1, 1, 3E) f32  fused QKV proj (Q pre-scaled)
    out_wt_ref, out_b_ref,         # (1, E, E)  bf16, (1, 1, E)  f32  attn out proj
    ln1_w_ref, ln1_b_ref,          # (1, 1, E)  f32
    ln2_w_ref, ln2_b_ref,          # (1, 1, E)  f32
    l1_wt_ref, l1_b_ref,           # (1, E, F)  bf16, (1, 1, F)  f32  FFN in
    l2_wt_ref, l2_b_ref,           # (1, F, E)  bf16, (1, 1, E)  f32  FFN out
    fln_w_ref, fln_b_ref,          # (1, E) f32                       final LayerNorm
    o_ref,                         # (B, S, E)   carried activation / final output
    *,
    num_heads: int,
):
    l = pl.program_id(0)
    num_layers = pl.num_programs(0)

    B, S, E = o_ref.shape
    H = num_heads
    Dh = E // H
    BS = B * S

    # Layer 0: seed the carry.  The output block index is independent of the
    # layer axis, so o_ref stays resident in VMEM for the whole stack.
    @pl.when(l == 0)
    def _():
        o_ref[...] = x_ref[...]

    x = o_ref[...].astype(jnp.float32).reshape(BS, E)          # (B*S, E) f32

    # ---- pre-norm + multi-head self-attention -------------------------------
    xn = _layernorm(x, ln1_w_ref[0], ln1_b_ref[0])

    # single fused QKV matmul: (B*S, E) @ (E, 3E) -> (B*S, 3E); bf16 in, f32 acc
    qkv = jnp.dot(xn.astype(jnp.bfloat16), in_wt_ref[0],
                  preferred_element_type=jnp.float32) + in_b_ref[0]
    q = qkv[:, 0 * E:1 * E]        # 1/sqrt(Dh) already folded into Wq / bq
    k = qkv[:, 1 * E:2 * E]
    v = qkv[:, 2 * E:3 * E]

    def to_heads(t):               # (B*S, E) -> (B*H, S, Dh), single relayout
        return t.reshape(B, S, H, Dh).transpose(0, 2, 1, 3).reshape(B * H, S, Dh)

    qh, kh, vh = to_heads(q), to_heads(k), to_heads(v)

    # batched attention over batch*heads at once (bf16 MXU inputs, f32 acc)
    s = jnp.einsum("bqd,bkd->bqk",
                   qh.astype(jnp.bfloat16), kh.astype(jnp.bfloat16),
                   preferred_element_type=jnp.float32)          # (B*H, S, S) f32
    s = s - jnp.max(s, axis=-1, keepdims=True)
    p = jnp.exp(s)
    p = p * pl.reciprocal(jnp.sum(p, axis=-1, keepdims=True), approx=True)
    ctx = jnp.einsum("bqk,bkd->bqd",
                     p.astype(jnp.bfloat16), vh.astype(jnp.bfloat16),
                     preferred_element_type=jnp.float32)        # (B*H, S, Dh)
    attn = ctx.reshape(B, H, S, Dh).transpose(0, 2, 1, 3).reshape(BS, E)

    attn = jnp.dot(attn.astype(jnp.bfloat16), out_wt_ref[0],
                   preferred_element_type=jnp.float32) + out_b_ref[0]
    x = x + attn                                   # residual 1 (dropout1 = id)

    # ---- pre-norm + feed-forward --------------------------------------------
    xn2 = _layernorm(x, ln2_w_ref[0], ln2_b_ref[0])
    h = jnp.dot(xn2.astype(jnp.bfloat16), l1_wt_ref[0],
                preferred_element_type=jnp.float32) + l1_b_ref[0]
    h = jnp.maximum(h, 0.0)                        # ReLU (dropout = id)
    x = x + jnp.dot(h.astype(jnp.bfloat16), l2_wt_ref[0],
                    preferred_element_type=jnp.float32) + l2_b_ref[0]   # residual 2

    # ---- write carry / finalize ---------------------------------------------
    @pl.when(l < num_layers - 1)
    def _():
        o_ref[...] = x.reshape(B, S, E).astype(o_ref.dtype)

    @pl.when(l == num_layers - 1)
    def _():
        y = _layernorm(x, fln_w_ref[...], fln_b_ref[...])       # final encoder LN
        o_ref[...] = y.reshape(B, S, E).astype(o_ref.dtype)


# ----------------------------- wrapper --------------------------------------


def transformer_encoder(x, layer_params, final_w, final_b, num_heads):
    """Runs the whole encoder stack (+ final LayerNorm) in a single pallas_call."""
    B, S, E = x.shape
    L = len(layer_params)
    F_ = layer_params[0]["l1_w"].shape[0]
    Dh = E // num_heads
    scale = 1.0 / math.sqrt(Dh)

    # Host-side prep: stack per-layer params along a leading layer axis,
    # pre-transpose weight matrices (x @ W form), fold the attention scale
    # into the Q rows of the fused QKV projection, and store matmul weights
    # in bf16 (halves HBM traffic / VMEM, native MXU input dtype).
    def qkv_wt(p):
        wt = p["in_w"].T                       # (E, 3E); cols [Q | K | V]
        return wt.at[:, :E].multiply(scale)

    def qkv_b(p):
        return p["in_b"].at[:, :E].multiply(scale)

    stack = lambda name: jnp.stack([p[name] for p in layer_params], axis=0)
    in_wt = jnp.stack([qkv_wt(p) for p in layer_params], axis=0).astype(jnp.bfloat16)
    in_b = jnp.stack([qkv_b(p) for p in layer_params], axis=0)           # (L, 1, 3E) f32
    out_wt = jnp.stack([p["out_w"].T for p in layer_params], axis=0).astype(jnp.bfloat16)
    l1_wt = jnp.stack([p["l1_w"].T for p in layer_params], axis=0).astype(jnp.bfloat16)
    l2_wt = jnp.stack([p["l2_w"].T for p in layer_params], axis=0).astype(jnp.bfloat16)
    out_b = stack("out_b")                                               # (L, 1, E)
    ln1_w, ln1_b = stack("ln1_w"), stack("ln1_b")                        # (L, 1, E)
    ln2_w, ln2_b = stack("ln2_w"), stack("ln2_b")                        # (L, 1, E)
    l1_b = stack("l1_b")                                                 # (L, 1, F)
    l2_b = stack("l2_b")                                                 # (L, 1, E)

    # per-layer weight block, indexed by the (arbitrary) layer grid axis
    lspec = lambda d1, d2: pl.BlockSpec((1, d1, d2), lambda l: (l, 0, 0))
    # whole-batch activation block, layer-independent (resident carry)
    aspec = pl.BlockSpec((B, S, E), lambda l: (0, 0, 0))
    # layer-independent (broadcast) block
    gspec = lambda d: pl.BlockSpec((1, d), lambda l: (0, 0))

    return pl.pallas_call(
        functools.partial(encoder_stack_kernel, num_heads=num_heads),
        out_shape=jax.ShapeDtypeStruct((B, S, E), x.dtype),
        grid_spec=pltpu.PrefetchScalarGridSpec(
            num_scalar_prefetch=0,
            grid=(L,),                        # layer axis only: weights DMA'd once
            in_specs=[
                aspec,                                             # x (seed)
                lspec(E, 3 * E), lspec(1, 3 * E),                  # in_wt, in_b
                lspec(E, E), lspec(1, E),                          # out_wt, out_b
                lspec(1, E), lspec(1, E),                          # ln1_w, ln1_b
                lspec(1, E), lspec(1, E),                          # ln2_w, ln2_b
                lspec(E, F_), lspec(1, F_),                        # l1_wt, l1_b
                lspec(F_, E), lspec(1, E),                         # l2_wt, l2_b
                gspec(E), gspec(E),                                # final LN w, b
            ],
            out_specs=aspec,
        ),
        compiler_params=pltpu.CompilerParams(
            dimension_semantics=("arbitrary",),   # layer axis is a carry loop
        ),
    )(
        x,
        in_wt, in_b,
        out_wt, out_b,
        ln1_w, ln1_b,
        ln2_w, ln2_b,
        l1_wt, l1_b,
        l2_wt, l2_b,
        final_w, final_b,
    )


# ----------------------------- param init -----------------------------------


def init_layer_params(key, embedding_dim, num_heads, dim_feedforward):
    E, F_ = embedding_dim, dim_feedforward
    ks = jax.random.split(key, 8)

    def unif(k, shape, fan_in):
        bound = 1.0 / math.sqrt(fan_in)
        return jax.random.uniform(k, shape, jnp.float32, -bound, bound)

    return {
        # nn.MultiheadAttention (in_proj packed [Wq; Wk; Wv], PyTorch layout (3E, E))
        "in_w": unif(ks[0], (3 * E, E), E),
        "in_b": jnp.zeros((1, 3 * E), jnp.float32),
        "out_w": unif(ks[1], (E, E), E),
        "out_b": jnp.zeros((1, E), jnp.float32),
        # LayerNorms
        "ln1_w": jnp.ones((1, E), jnp.float32),
        "ln1_b": jnp.zeros((1, E), jnp.float32),
        "ln2_w": jnp.ones((1, E), jnp.float32),
        "ln2_b": jnp.zeros((1, E), jnp.float32),
        # feed-forward Linears (PyTorch layout (out, in))
        "l1_w": unif(ks[2], (F_, E), E),
        "l1_b": unif(ks[3], (1, F_), E),
        "l2_w": unif(ks[4], (E, F_), F_),
        "l2_b": unif(ks[5], (1, E), F_),
    }


# ----------------------------- reference (pure JAX, f32) ---------------------


def _ref_forward(x, layer_params, final_w, final_b, num_heads):
    def ln(y, w, b, eps=1e-5):
        mu = jnp.mean(y, axis=-1, keepdims=True)
        var = jnp.mean((y - mu) ** 2, axis=-1, keepdims=True)
        return (y - mu) / jnp.sqrt(var + eps) * w + b

    B, S, E = x.shape
    H = num_heads
    Dh = E // H
    for p in layer_params:
        xn = ln(x, p["ln1_w"], p["ln1_b"])
        qkv = jnp.einsum("bse,fe->bsf", xn, p["in_w"]) + p["in_b"][None]
        q, k, v = jnp.split(qkv, 3, axis=-1)
        q = q.reshape(B, S, H, Dh).transpose(0, 2, 1, 3)
        k = k.reshape(B, S, H, Dh).transpose(0, 2, 1, 3)
        v = v.reshape(B, S, H, Dh).transpose(0, 2, 1, 3)
        s = jnp.einsum("bhqd,bhkd->bhqk", q, k) / math.sqrt(Dh)
        pattn = jax.nn.softmax(s, axis=-1)
        o = jnp.einsum("bhqk,bhkd->bhqd", pattn, v).transpose(0, 2, 1, 3).reshape(B, S, E)
        o = jnp.einsum("bse,fe->bsf", o, p["out_w"]) + p["out_b"][None]
        x = x + o
        xn2 = ln(x, p["ln2_w"], p["ln2_b"])
        h = jax.nn.relu(jnp.einsum("bse,fe->bsf", xn2, p["l1_w"]) + p["l1_b"][None])
        f = jnp.einsum("bsf,ef->bse", h, p["l2_w"]) + p["l2_b"][None]
        x = x + f
    return ln(x, final_w, final_b)


# ----------------------------- main ------------------------------------------

if __name__ == "__main__":
    # module hyperparameters (small, but lane/MXU-friendly: multiples of 128)
    embedding_dim = 128
    num_heads = 4
    num_encoder_layers = 2
    dim_feedforward = 256
    dropout = 0.0  # inference: dropout is identity

    B, S = 2, 8

    key = jax.random.PRNGKey(0)
    key_x, *layer_keys = jax.random.split(key, 1 + num_encoder_layers)

    x = jax.random.normal(key_x, (B, S, embedding_dim), jnp.float32)

    layer_params = [
        init_layer_params(k, embedding_dim, num_heads, dim_feedforward)
        for k in layer_keys
    ]
    final_w = jnp.ones((1, embedding_dim), jnp.float32)
    final_b = jnp.zeros((1, embedding_dim), jnp.float32)

    out = transformer_encoder(x, layer_params, final_w, final_b, num_heads)
    out = jax.block_until_ready(out)

    ref = _ref_forward(x, layer_params, final_w, final_b, num_heads)
    assert out.shape == (B, S, embedding_dim)
    # tolerance accounts for bf16 MXU inputs + approx (EUP) softmax reciprocal
    assert jnp.allclose(out, ref, atol=2.5e-2, rtol=2.5e-2), "mismatch vs reference"

    print("KERNEL_OK")
</pallas_src>

<mosaic_0001>
module attributes {stable_mosaic.version = 11 : i64} {
  func.func @encoder_stack_kernel(%arg0: i32, %arg1: memref<2x8x128xf32, #tpu.memory_space<vmem>>, %arg2: memref<1x128x384xbf16, #tpu.memory_space<vmem>>, %arg3: memref<1x1x384xf32, #tpu.memory_space<vmem>>, %arg4: memref<1x128x128xbf16, #tpu.memory_space<vmem>>, %arg5: memref<1x1x128xf32, #tpu.memory_space<vmem>>, %arg6: memref<1x1x128xf32, #tpu.memory_space<vmem>>, %arg7: memref<1x1x128xf32, #tpu.memory_space<vmem>>, %arg8: memref<1x1x128xf32, #tpu.memory_space<vmem>>, %arg9: memref<1x1x128xf32, #tpu.memory_space<vmem>>, %arg10: memref<1x128x256xbf16, #tpu.memory_space<vmem>>, %arg11: memref<1x1x256xf32, #tpu.memory_space<vmem>>, %arg12: memref<1x256x128xbf16, #tpu.memory_space<vmem>>, %arg13: memref<1x1x128xf32, #tpu.memory_space<vmem>>, %arg14: memref<1x128xf32, #tpu.memory_space<vmem>>, %arg15: memref<1x128xf32, #tpu.memory_space<vmem>>, %arg16: memref<2x8x128xf32, #tpu.memory_space<vmem>>) attributes {dimension_semantics = [#tpu.dimension_semantics<arbitrary>], iteration_bounds = array<i64: 2>, scalar_prefetch = 0 : i64, scratch_operands = 0 : i64, tpu.core_type = #tpu.core_type<tc>, window_params = [{pipeline_mode = #tpu.pipeline_mode<synchronous>, transform_indices = @transform_0, window_bounds = array<i64: 2, 8, 128>}, {transform_indices = @transform_1, window_bounds = array<i64: 1, 128, 384>}, {transform_indices = @transform_2, window_bounds = array<i64: 1, 1, 384>}, {transform_indices = @transform_3, window_bounds = array<i64: 1, 128, 128>}, {transform_indices = @transform_4, window_bounds = array<i64: 1, 1, 128>}, {transform_indices = @transform_5, window_bounds = array<i64: 1, 1, 128>}, {transform_indices = @transform_6, window_bounds = array<i64: 1, 1, 128>}, {transform_indices = @transform_7, window_bounds = array<i64: 1, 1, 128>}, {transform_indices = @transform_8, window_bounds = array<i64: 1, 1, 128>}, {transform_indices = @transform_9, window_bounds = array<i64: 1, 128, 256>}, {transform_indices = @transform_10, window_bounds = array<i64: 1, 1, 256>}, {transform_indices = @transform_11, window_bounds = array<i64: 1, 256, 128>}, {transform_indices = @transform_12, window_bounds = array<i64: 1, 1, 128>}, {pipeline_mode = #tpu.pipeline_mode<synchronous>, transform_indices = @transform_13, window_bounds = array<i64: 1, 128>}, {pipeline_mode = #tpu.pipeline_mode<synchronous>, transform_indices = @transform_14, window_bounds = array<i64: 1, 128>}, {pipeline_mode = #tpu.pipeline_mode<synchronous>, transform_indices = @transform_15, window_bounds = array<i64: 2, 8, 128>}]} {
    %c0_i32 = arith.constant 0 : i32
    %0 = arith.cmpi eq, %arg0, %c0_i32 : i32
    %1 = arith.extui %0 : i1 to i32
    %c0_i32_0 = arith.constant 0 : i32
    %2 = arith.cmpi ne, %1, %c0_i32_0 : i32
    scf.if %2 {
      %c0_60 = arith.constant 0 : index
      %c0_61 = arith.constant 0 : index
      %c0_62 = arith.constant 0 : index
      %130 = vector.load %arg1[%c0_60, %c0_61, %c0_62] : memref<2x8x128xf32, #tpu.memory_space<vmem>>, vector<2x8x128xf32>
      %c0_63 = arith.constant 0 : index
      %c0_64 = arith.constant 0 : index
      %c0_65 = arith.constant 0 : index
      %131 = vector.load %arg16[%c0_63, %c0_64, %c0_65] : memref<2x8x128xf32, #tpu.memory_space<vmem>>, vector<2x8x128xf32>
      tpu.vector_store %arg16[%c0_63, %c0_64, %c0_65], %130 {strides = array<i32>} : memref<2x8x128xf32, #tpu.memory_space<vmem>>, vector<2x8x128xf32>,
    } else {
    }
    %c0 = arith.constant 0 : index
    %c0_1 = arith.constant 0 : index
    %c0_2 = arith.constant 0 : index
    %3 = vector.load %arg16[%c0, %c0_1, %c0_2] : memref<2x8x128xf32, #tpu.memory_space<vmem>>, vector<2x8x128xf32>
    %4 = vector.shape_cast %3 : vector<2x8x128xf32> to vector<16x128xf32>
    %c0_3 = arith.constant 0 : index
    %c0_4 = arith.constant 0 : index
    %c0_5 = arith.constant 0 : index
    %5 = vector.load %arg6[%c0_3, %c0_4, %c0_5] : memref<1x1x128xf32, #tpu.memory_space<vmem>>, vector<1x1x128xf32>
    %6 = vector.shape_cast %5 : vector<1x1x128xf32> to vector<1x128xf32>
    %c0_6 = arith.constant 0 : index
    %c0_7 = arith.constant 0 : index
    %c0_8 = arith.constant 0 : index
    %7 = vector.load %arg7[%c0_6, %c0_7, %c0_8] : memref<1x1x128xf32, #tpu.memory_space<vmem>>, vector<1x1x128xf32>
    %8 = vector.shape_cast %7 : vector<1x1x128xf32> to vector<1x128xf32>
    %cst = arith.constant dense<0.000000e+00> : vector<16xf32>
    %9 = vector.multi_reduction <add>, %4, %cst [1] : vector<16x128xf32> to vector<16xf32>
    %10 = vector.shape_cast %9 : vector<16xf32> to vector<16x1xf32>
    %cst_9 = arith.constant 1.280000e+02 : f32
    %11 = vector.broadcast %cst_9 : f32 to vector<16x1xf32>
    %12 = arith.divf %10, %11 : vector<16x1xf32>
    %13 = vector.broadcast %12 : vector<16x1xf32> to vector<16x128xf32>
    %14 = arith.subf %4, %13 : vector<16x128xf32>
    %15 = arith.mulf %14, %14 : vector<16x128xf32>
    %cst_10 = arith.constant dense<0.000000e+00> : vector<16xf32>
    %16 = vector.multi_reduction <add>, %15, %cst_10 [1] : vector<16x128xf32> to vector<16xf32>
    %17 = vector.shape_cast %16 : vector<16xf32> to vector<16x1xf32>
    %cst_11 = arith.constant 1.280000e+02 : f32
    %18 = vector.broadcast %cst_11 : f32 to vector<16x1xf32>
    %19 = arith.divf %17, %18 : vector<16x1xf32>
    %20 = vector.broadcast %12 : vector<16x1xf32> to vector<16x128xf32>
    %21 = arith.subf %4, %20 : vector<16x128xf32>
    %cst_12 = arith.constant 9.99999974E-6 : f32
    %22 = vector.broadcast %cst_12 : f32 to vector<16x1xf32>
    %23 = arith.addf %19, %22 : vector<16x1xf32>
    %24 = math.rsqrt %23 : vector<16x1xf32>
    %25 = vector.broadcast %24 : vector<16x1xf32> to vector<16x128xf32>
    %26 = arith.mulf %21, %25 : vector<16x128xf32>
    %27 = vector.broadcast %6 : vector<1x128xf32> to vector<16x128xf32>
    %28 = arith.mulf %26, %27 : vector<16x128xf32>
    %29 = vector.broadcast %8 : vector<1x128xf32> to vector<16x128xf32>
    %30 = arith.addf %28, %29 : vector<16x128xf32>
    %31 = arith.truncf %30 : vector<16x128xf32> to vector<16x128xbf16>
    %c0_13 = arith.constant 0 : index
    %c0_14 = arith.constant 0 : index
    %c0_15 = arith.constant 0 : index
    %32 = vector.load %arg2[%c0_13, %c0_14, %c0_15] : memref<1x128x384xbf16, #tpu.memory_space<vmem>>, vector<1x128x384xbf16>
    %33 = vector.shape_cast %32 : vector<1x128x384xbf16> to vector<128x384xbf16>
    %cst_16 = arith.constant dense<0.000000e+00> : vector<16x384xf32>
    %34 = tpu.matmul %31, %33, %cst_16 {dimension_numbers = #tpu.dot_dimension_numbers<[1], [0], [0], [1], [0, 0, 1, 1], [], []>} : vector<16x128xbf16>, vector<128x384xbf16>, vector<16x384xf32> -> vector<16x384xf32>
    %c0_17 = arith.constant 0 : index
    %c0_18 = arith.constant 0 : index
    %c0_19 = arith.constant 0 : index
    %35 = vector.load %arg3[%c0_17, %c0_18, %c0_19] : memref<1x1x384xf32, #tpu.memory_space<vmem>>, vector<1x1x384xf32>
    %36 = vector.shape_cast %35 : vector<1x1x384xf32> to vector<1x384xf32>
    %37 = vector.broadcast %36 : vector<1x384xf32> to vector<16x384xf32>
    %38 = arith.addf %34, %37 : vector<16x384xf32>
    %39 = vector.extract_strided_slice %38 {offsets = [0, 0], sizes = [16, 128], strides = [1, 1]} : vector<16x384xf32> to vector<16x128xf32>
    %40 = vector.extract_strided_slice %38 {offsets = [0, 128], sizes = [16, 128], strides = [1, 1]} : vector<16x384xf32> to vector<16x128xf32>
    %41 = vector.extract_strided_slice %38 {offsets = [0, 256], sizes = [16, 128], strides = [1, 1]} : vector<16x384xf32> to vector<16x128xf32>
    %42 = vector.shape_cast %39 : vector<16x128xf32> to vector<2x8x4x32xf32>
    %43 = tpu.transpose %42, [0, 2, 1, 3] : vector<2x8x4x32xf32> -> vector<2x4x8x32xf32>
    %44 = vector.shape_cast %43 : vector<2x4x8x32xf32> to vector<8x8x32xf32>
    %45 = vector.shape_cast %40 : vector<16x128xf32> to vector<2x8x4x32xf32>
    %46 = tpu.transpose %45, [0, 2, 1, 3] : vector<2x8x4x32xf32> -> vector<2x4x8x32xf32>
    %47 = vector.shape_cast %46 : vector<2x4x8x32xf32> to vector<8x8x32xf32>
    %48 = vector.shape_cast %41 : vector<16x128xf32> to vector<2x8x4x32xf32>
    %49 = tpu.transpose %48, [0, 2, 1, 3] : vector<2x8x4x32xf32> -> vector<2x4x8x32xf32>
    %50 = vector.shape_cast %49 : vector<2x4x8x32xf32> to vector<8x8x32xf32>
    %51 = arith.truncf %44 : vector<8x8x32xf32> to vector<8x8x32xbf16>
    %52 = arith.truncf %47 : vector<8x8x32xf32> to vector<8x8x32xbf16>
    "tpu.trace_start"() <{level = 10 : i32, message = "bqd,bkd->bqk"}> : () -> ()
    %cst_20 = arith.constant dense<0.000000e+00> : vector<8x8x8xf32>
    %53 = tpu.matmul %51, %52, %cst_20 {dimension_numbers = #tpu.dot_dimension_numbers<[2], [2], [1], [1], [0, 0, 0, 1, 1, 1], [0], [0]>} : vector<8x8x32xbf16>, vector<8x8x32xbf16>, vector<8x8x8xf32> -> vector<8x8x8xf32>
    "tpu.trace_stop"() : () -> ()
    %cst_21 = arith.constant dense<0xFF800000> : vector<8x8xf32>
    %54 = vector.multi_reduction <maximumf>, %53, %cst_21 [2] : vector<8x8x8xf32> to vector<8x8xf32>
    %55 = vector.shape_cast %54 : vector<8x8xf32> to vector<8x8x1xf32>
    %56 = vector.broadcast %55 : vector<8x8x1xf32> to vector<8x8x8xf32>
    %57 = arith.subf %53, %56 : vector<8x8x8xf32>
    %58 = math.exp %57 : vector<8x8x8xf32>
    %cst_22 = arith.constant dense<0.000000e+00> : vector<8x8xf32>
    %59 = vector.multi_reduction <add>, %58, %cst_22 [2] : vector<8x8x8xf32> to vector<8x8xf32>
    %60 = vector.shape_cast %59 : vector<8x8xf32> to vector<8x8x1xf32>
    %61 = tpu.reciprocal %60 {approx = true} : vector<8x8x1xf32> -> vector<8x8x1xf32>
    %62 = vector.broadcast %61 : vector<8x8x1xf32> to vector<8x8x8xf32>
    %63 = arith.mulf %58, %62 : vector<8x8x8xf32>
    %64 = arith.truncf %63 : vector<8x8x8xf32> to vector<8x8x8xbf16>
    %65 = arith.truncf %50 : vector<8x8x32xf32> to vector<8x8x32xbf16>
    "tpu.trace_start"() <{level = 10 : i32, message = "bqk,bkd->bqd"}> : () -> ()
    %cst_23 = arith.constant dense<0.000000e+00> : vector<8x8x32xf32>
    %66 = tpu.matmul %64, %65, %cst_23 {dimension_numbers = #tpu.dot_dimension_numbers<[2], [1], [1], [2], [0, 0, 0, 1, 1, 2], [0], [0]>} : vector<8x8x8xbf16>, vector<8x8x32xbf16>, vector<8x8x32xf32> -> vector<8x8x32xf32>
    "tpu.trace_stop"() : () -> ()
    %67 = vector.shape_cast %66 : vector<8x8x32xf32> to vector<2x4x8x32xf32>
    %68 = tpu.transpose %67, [0, 2, 1, 3] : vector<2x4x8x32xf32> -> vector<2x8x4x32xf32>
    %69 = vector.shape_cast %68 : vector<2x8x4x32xf32> to vector<16x128xf32>
    %70 = arith.truncf %69 : vector<16x128xf32> to vector<16x128xbf16>
    %c0_24 = arith.constant 0 : index
    %c0_25 = arith.constant 0 : index
    %c0_26 = arith.constant 0 : index
    %71 = vector.load %arg4[%c0_24, %c0_25, %c0_26] : memref<1x128x128xbf16, #tpu.memory_space<vmem>>, vector<1x128x128xbf16>
    %72 = vector.shape_cast %71 : vector<1x128x128xbf16> to vector<128x128xbf16>
    %cst_27 = arith.constant dense<0.000000e+00> : vector<16x128xf32>
    %73 = tpu.matmul %70, %72, %cst_27 {dimension_numbers = #tpu.dot_dimension_numbers<[1], [0], [0], [1], [0, 0, 1, 1], [], []>} : vector<16x128xbf16>, vector<128x128xbf16>, vector<16x128xf32> -> vector<16x128xf32>
    %c0_28 = arith.constant 0 : index
    %c0_29 = arith.constant 0 : index
    %c0_30 = arith.constant 0 : index
    %74 = vector.load %arg5[%c0_28, %c0_29, %c0_30] : memref<1x1x128xf32, #tpu.memory_space<vmem>>, vector<1x1x128xf32>
    %75 = vector.shape_cast %74 : vector<1x1x128xf32> to vector<1x128xf32>
    %76 = vector.broadcast %75 : vector<1x128xf32> to vector<16x128xf32>
    %77 = arith.addf %73, %76 : vector<16x128xf32>
    %78 = arith.addf %4, %77 : vector<16x128xf32>
    %c0_31 = arith.constant 0 : index
    %c0_32 = arith.constant 0 : index
    %c0_33 = arith.constant 0 : index
    %79 = vector.load %arg8[%c0_31, %c0_32, %c0_33] : memref<1x1x128xf32, #tpu.memory_space<vmem>>, vector<1x1x128xf32>
    %80 = vector.shape_cast %79 : vector<1x1x128xf32> to vector<1x128xf32>
    %c0_34 = arith.constant 0 : index
    %c0_35 = arith.constant 0 : index
    %c0_36 = arith.constant 0 : index
    %81 = vector.load %arg9[%c0_34, %c0_35, %c0_36] : memref<1x1x128xf32, #tpu.memory_space<vmem>>, vector<1x1x128xf32>
    %82 = vector.shape_cast %81 : vector<1x1x128xf32> to vector<1x128xf32>
    %cst_37 = arith.constant dense<0.000000e+00> : vector<16xf32>
    %83 = vector.multi_reduction <add>, %78, %cst_37 [1] : vector<16x128xf32> to vector<16xf32>
    %84 = vector.shape_cast %83 : vector<16xf32> to vector<16x1xf32>
    %cst_38 = arith.constant 1.280000e+02 : f32
    %85 = vector.broadcast %cst_38 : f32 to vector<16x1xf32>
    %86 = arith.divf %84, %85 : vector<16x1xf32>
    %87 = vector.broadcast %86 : vector<16x1xf32> to vector<16x128xf32>
    %88 = arith.subf %78, %87 : vector<16x128xf32>
    %89 = arith.mulf %88, %88 : vector<16x128xf32>
    %cst_39 = arith.constant dense<0.000000e+00> : vector<16xf32>
    %90 = vector.multi_reduction <add>, %89, %cst_39 [1] : vector<16x128xf32> to vector<16xf32>
    %91 = vector.shape_cast %90 : vector<16xf32> to vector<16x1xf32>
    %cst_40 = arith.constant 1.280000e+02 : f32
    %92 = vector.broadcast %cst_40 : f32 to vector<16x1xf32>
    %93 = arith.divf %91, %92 : vector<16x1xf32>
    %94 = vector.broadcast %86 : vector<16x1xf32> to vector<16x128xf32>
    %95 = arith.subf %78, %94 : vector<16x128xf32>
    %cst_41 = arith.constant 9.99999974E-6 : f32
    %96 = vector.broadcast %cst_41 : f32 to vector<16x1xf32>
    %97 = arith.addf %93, %96 : vector<16x1xf32>
    %98 = math.rsqrt %97 : vector<16x1xf32>
    %99 = vector.broadcast %98 : vector<16x1xf32> to vector<16x128xf32>
    %100 = arith.mulf %95, %99 : vector<16x128xf32>
    %101 = vector.broadcast %80 : vector<1x128xf32> to vector<16x128xf32>
    %102 = arith.mulf %100, %101 : vector<16x128xf32>
    %103 = vector.broadcast %82 : vector<1x128xf32> to vector<16x128xf32>
    %104 = arith.addf %102, %103 : vector<16x128xf32>
    %105 = arith.truncf %104 : vector<16x128xf32> to vector<16x128xbf16>
    %c0_42 = arith.constant 0 : index
    %c0_43 = arith.constant 0 : index
    %c0_44 = arith.constant 0 : index
    %106 = vector.load %arg10[%c0_42, %c0_43, %c0_44] : memref<1x128x256xbf16, #tpu.memory_space<vmem>>, vector<1x128x256xbf16>
    %107 = vector.shape_cast %106 : vector<1x128x256xbf16> to vector<128x256xbf16>
    %cst_45 = arith.constant dense<0.000000e+00> : vector<16x256xf32>
    %108 = tpu.matmul %105, %107, %cst_45 {dimension_numbers = #tpu.dot_dimension_numbers<[1], [0], [0], [1], [0, 0, 1, 1], [], []>} : vector<16x128xbf16>, vector<128x256xbf16>, vector<16x256xf32> -> vector<16x256xf32>
    %c0_46 = arith.constant 0 : index
    %c0_47 = arith.constant 0 : index
    %c0_48 = arith.constant 0 : index
    %109 = vector.load %arg11[%c0_46, %c0_47, %c0_48] : memref<1x1x256xf32, #tpu.memory_space<vmem>>, vector<1x1x256xf32>
    %110 = vector.shape_cast %109 : vector<1x1x256xf32> to vector<1x256xf32>
    %111 = vector.broadcast %110 : vector<1x256xf32> to vector<16x256xf32>
    %112 = arith.addf %108, %111 : vector<16x256xf32>
    %cst_49 = arith.constant 0.000000e+00 : f32
    %113 = vector.broadcast %cst_49 : f32 to vector<16x256xf32>
    %114 = arith.maximumf %112, %113 : vector<16x256xf32>
    %115 = arith.truncf %114 : vector<16x256xf32> to vector<16x256xbf16>
    %c0_50 = arith.constant 0 : index
    %c0_51 = arith.constant 0 : index
    %c0_52 = arith.constant 0 : index
    %116 = vector.load %arg12[%c0_50, %c0_51, %c0_52] : memref<1x256x128xbf16, #tpu.memory_space<vmem>>, vector<1x256x128xbf16>
    %117 = vector.shape_cast %116 : vector<1x256x128xbf16> to vector<256x128xbf16>
    %cst_53 = arith.constant dense<0.000000e+00> : vector<16x128xf32>
    %118 = tpu.matmul %115, %117, %cst_53 {dimension_numbers = #tpu.dot_dimension_numbers<[1], [0], [0], [1], [0, 0, 1, 1], [], []>} : vector<16x256xbf16>, vector<256x128xbf16>, vector<16x128xf32> -> vector<16x128xf32>
    %119 = arith.addf %78, %118 : vector<16x128xf32>
    %c0_54 = arith.constant 0 : index
    %c0_55 = arith.constant 0 : index
    %c0_56 = arith.constant 0 : index
    %120 = vector.load %arg13[%c0_54, %c0_55, %c0_56] : memref<1x1x128xf32, #tpu.memory_space<vmem>>, vector<1x1x128xf32>
    %121 = vector.shape_cast %120 : vector<1x1x128xf32> to vector<1x128xf32>
    %122 = vector.broadcast %121 : vector<1x128xf32> to vector<16x128xf32>
    %123 = arith.addf %119, %122 : vector<16x128xf32>
    %c1_i32 = arith.constant 1 : i32
    %124 = arith.cmpi slt, %arg0, %c1_i32 : i32
    %125 = arith.extui %124 : i1 to i32
    %c0_i32_57 = arith.constant 0 : i32
    %126 = arith.cmpi ne, %125, %c0_i32_57 : i32
    scf.if %126 {
      %130 = vector.shape_cast %123 : vector<16x128xf32> to vector<2x8x128xf32>
      %c0_60 = arith.constant 0 : index
      %c0_61 = arith.constant 0 : index
      %c0_62 = arith.constant 0 : index
      %131 = vector.load %arg16[%c0_60, %c0_61, %c0_62] : memref<2x8x128xf32, #tpu.memory_space<vmem>>, vector<2x8x128xf32>
      tpu.vector_store %arg16[%c0_60, %c0_61, %c0_62], %130 {strides = array<i32>} : memref<2x8x128xf32, #tpu.memory_space<vmem>>, vector<2x8x128xf32>,
    } else {
    }
    %c1_i32_58 = arith.constant 1 : i32
    %127 = arith.cmpi eq, %arg0, %c1_i32_58 : i32
    %128 = arith.extui %127 : i1 to i32
    %c0_i32_59 = arith.constant 0 : i32
    %129 = arith.cmpi ne, %128, %c0_i32_59 : i32
    scf.if %129 {
      %c0_60 = arith.constant 0 : index
      %c0_61 = arith.constant 0 : index
      %130 = vector.load %arg14[%c0_60, %c0_61] : memref<1x128xf32, #tpu.memory_space<vmem>>, vector<1x128xf32>
      %c0_62 = arith.constant 0 : index
      %c0_63 = arith.constant 0 : index
      %131 = vector.load %arg15[%c0_62, %c0_63] : memref<1x128xf32, #tpu.memory_space<vmem>>, vector<1x128xf32>
      %cst_64 = arith.constant dense<0.000000e+00> : vector<16xf32>
      %132 = vector.multi_reduction <add>, %123, %cst_64 [1] : vector<16x128xf32> to vector<16xf32>
      %133 = vector.shape_cast %132 : vector<16xf32> to vector<16x1xf32>
      %cst_65 = arith.constant 1.280000e+02 : f32
      %134 = vector.broadcast %cst_65 : f32 to vector<16x1xf32>
      %135 = arith.divf %133, %134 : vector<16x1xf32>
      %136 = vector.broadcast %135 : vector<16x1xf32> to vector<16x128xf32>
      %137 = arith.subf %123, %136 : vector<16x128xf32>
      %138 = arith.mulf %137, %137 : vector<16x128xf32>
      %cst_66 = arith.constant dense<0.000000e+00> : vector<16xf32>
      %139 = vector.multi_reduction <add>, %138, %cst_66 [1] : vector<16x128xf32> to vector<16xf32>
      %140 = vector.shape_cast %139 : vector<16xf32> to vector<16x1xf32>
      %cst_67 = arith.constant 1.280000e+02 : f32
      %141 = vector.broadcast %cst_67 : f32 to vector<16x1xf32>
      %142 = arith.divf %140, %141 : vector<16x1xf32>
      %143 = vector.broadcast %135 : vector<16x1xf32> to vector<16x128xf32>
      %144 = arith.subf %123, %143 : vector<16x128xf32>
      %cst_68 = arith.constant 9.99999974E-6 : f32
      %145 = vector.broadcast %cst_68 : f32 to vector<16x1xf32>
      %146 = arith.addf %142, %145 : vector<16x1xf32>
      %147 = math.rsqrt %146 : vector<16x1xf32>
      %148 = vector.broadcast %147 : vector<16x1xf32> to vector<16x128xf32>
      %149 = arith.mulf %144, %148 : vector<16x128xf32>
      %150 = vector.broadcast %130 : vector<1x128xf32> to vector<16x128xf32>
      %151 = arith.mulf %149, %150 : vector<16x128xf32>
      %152 = vector.broadcast %131 : vector<1x128xf32> to vector<16x128xf32>
      %153 = arith.addf %151, %152 : vector<16x128xf32>
      %154 = vector.shape_cast %153 : vector<16x128xf32> to vector<2x8x128xf32>
      %c0_69 = arith.constant 0 : index
      %c0_70 = arith.constant 0 : index
      %c0_71 = arith.constant 0 : index
      %155 = vector.load %arg16[%c0_69, %c0_70, %c0_71] : memref<2x8x128xf32, #tpu.memory_space<vmem>>, vector<2x8x128xf32>
      tpu.vector_store %arg16[%c0_69, %c0_70, %c0_71], %154 {strides = array<i32>} : memref<2x8x128xf32, #tpu.memory_space<vmem>>, vector<2x8x128xf32>,
    } else {
    }
    return
  }
  func.func @transform_0(%arg0: i32) -> (i32, i32, i32) {
    %c0_i32 = arith.constant 0 : i32
    %c0_i32_0 = arith.constant 0 : i32
    %c0_i32_1 = arith.constant 0 : i32
    %c0_i32_2 = arith.constant 0 : i32
    return %c0_i32, %c0_i32_0, %c0_i32_1 : i32, i32, i32
  }
  func.func @transform_1(%arg0: i32) -> (i32, i32, i32) {
    %c0_i32 = arith.constant 0 : i32
    %c0_i32_0 = arith.constant 0 : i32
    %c0_i32_1 = arith.constant 0 : i32
    return %arg0, %c0_i32, %c0_i32_0 : i32, i32, i32
  }
  func.func @transform_2(%arg0: i32) -> (i32, i32, i32) {
    %c0_i32 = arith.constant 0 : i32
    %c0_i32_0 = arith.constant 0 : i32
    %c0_i32_1 = arith.constant 0 : i32
    return %arg0, %c0_i32, %c0_i32_0 : i32, i32, i32
  }
  func.func @transform_3(%arg0: i32) -> (i32, i32, i32) {
    %c0_i32 = arith.constant 0 : i32
    %c0_i32_0 = arith.constant 0 : i32
    %c0_i32_1 = arith.constant 0 : i32
    return %arg0, %c0_i32, %c0_i32_0 : i32, i32, i32
  }
  func.func @transform_4(%arg0: i32) -> (i32, i32, i32) {
    %c0_i32 = arith.constant 0 : i32
    %c0_i32_0 = arith.constant 0 : i32
    %c0_i32_1 = arith.constant 0 : i32
    return %arg0, %c0_i32, %c0_i32_0 : i32, i32, i32
  }
  func.func @transform_5(%arg0: i32) -> (i32, i32, i32) {
    %c0_i32 = arith.constant 0 : i32
    %c0_i32_0 = arith.constant 0 : i32
    %c0_i32_1 = arith.constant 0 : i32
    return %arg0, %c0_i32, %c0_i32_0 : i32, i32, i32
  }
  func.func @transform_6(%arg0: i32) -> (i32, i32, i32) {
    %c0_i32 = arith.constant 0 : i32
    %c0_i32_0 = arith.constant 0 : i32
    %c0_i32_1 = arith.constant 0 : i32
    return %arg0, %c0_i32, %c0_i32_0 : i32, i32, i32
  }
  func.func @transform_7(%arg0: i32) -> (i32, i32, i32) {
    %c0_i32 = arith.constant 0 : i32
    %c0_i32_0 = arith.constant 0 : i32
    %c0_i32_1 = arith.constant 0 : i32
    return %arg0, %c0_i32, %c0_i32_0 : i32, i32, i32
  }
  func.func @transform_8(%arg0: i32) -> (i32, i32, i32) {
    %c0_i32 = arith.constant 0 : i32
    %c0_i32_0 = arith.constant 0 : i32
    %c0_i32_1 = arith.constant 0 : i32
    return %arg0, %c0_i32, %c0_i32_0 : i32, i32, i32
  }
  func.func @transform_9(%arg0: i32) -> (i32, i32, i32) {
    %c0_i32 = arith.constant 0 : i32
    %c0_i32_0 = arith.constant 0 : i32
    %c0_i32_1 = arith.constant 0 : i32
    return %arg0, %c0_i32, %c0_i32_0 : i32, i32, i32
  }
  func.func @transform_10(%arg0: i32) -> (i32, i32, i32) {
    %c0_i32 = arith.constant 0 : i32
    %c0_i32_0 = arith.constant 0 : i32
    %c0_i32_1 = arith.constant 0 : i32
    return %arg0, %c0_i32, %c0_i32_0 : i32, i32, i32
  }
  func.func @transform_11(%arg0: i32) -> (i32, i32, i32) {
    %c0_i32 = arith.constant 0 : i32
    %c0_i32_0 = arith.constant 0 : i32
    %c0_i32_1 = arith.constant 0 : i32
    return %arg0, %c0_i32, %c0_i32_0 : i32, i32, i32
  }
  func.func @transform_12(%arg0: i32) -> (i32, i32, i32) {
    %c0_i32 = arith.constant 0 : i32
    %c0_i32_0 = arith.constant 0 : i32
    %c0_i32_1 = arith.constant 0 : i32
    return %arg0, %c0_i32, %c0_i32_0 : i32, i32, i32
  }
  func.func @transform_13(%arg0: i32) -> (i32, i32) {
    %c0_i32 = arith.constant 0 : i32
    %c0_i32_0 = arith.constant 0 : i32
    %c0_i32_1 = arith.constant 0 : i32
    return %c0_i32, %c0_i32_0 : i32, i32
  }
  func.func @transform_14(%arg0: i32) -> (i32, i32) {
    %c0_i32 = arith.constant 0 : i32
    %c0_i32_0 = arith.constant 0 : i32
    %c0_i32_1 = arith.constant 0 : i32
    return %c0_i32, %c0_i32_0 : i32, i32
  }
  func.func @transform_15(%arg0: i32) -> (i32, i32, i32) {
    %c0_i32 = arith.constant 0 : i32
    %c0_i32_0 = arith.constant 0 : i32
    %c0_i32_1 = arith.constant 0 : i32
    %c0_i32_2 = arith.constant 0 : i32
    return %c0_i32, %c0_i32_0, %c0_i32_1 : i32, i32, i32
  }
}

</mosaic_0001>

<bundles_post_ra>
// kernel: tpu_custom_call.1
= control target key start
LH: loop header
LB: loop body
LE: loop exit
PB: predicated region body
PF: predicated region fallthrough
CT: control target
= control target key end

     0   :  { %s5665_s0 = inlined_call_operand.hbm [shape: f32[2,8,128], index: 0, kind: input, shape index: {}]   ;;  %s5666_s1 = inlined_call_operand.hbm [shape: bf16[2,128,384], index: 1, kind: input, shape index: {}]   ;;  %s5667_s2 = inlined_call_operand.vmem [shape: f32[2,1,384], index: 2, kind: input, shape index: {}]   ;;  %s5668_s3 = inlined_call_operand.hbm [shape: bf16[2,128,128], index: 3, kind: input, shape index: {}]   ;;  %s5669_s4 = inlined_call_operand.vmem [shape: f32[2,1,128], index: 4, kind: input, shape index: {}]   ;;  %s5670_s5 = inlined_call_operand.vmem [shape: f32[2,1,128], index: 5, kind: input, shape index: {}]   ;;  %s5671_s6 = inlined_call_operand.vmem [shape: f32[2,1,128], index: 6, kind: input, shape index: {}]   ;;  %s5672_s7 = inlined_call_operand.vmem [shape: f32[2,1,128], index: 7, kind: input, shape index: {}]   ;;  %s5673_s8 = inlined_call_operand.vmem [shape: f32[2,1,128], index: 8, kind: input, shape index: {}]   ;;  %s5674_s9 = inlined_call_operand.hbm [shape: bf16[2,128,256], index: 9, kind: input, shape index: {}]   ;;  %s5675_s10 = inlined_call_operand.vmem [shape: f32[2,1,256], index: 10, kind: input, shape index: {}]   ;;  %s5676_s11 = inlined_call_operand.hbm [shape: bf16[2,256,128], index: 11, kind: input, shape index: {}]   ;;  %s5677_s12 = inlined_call_operand.vmem [shape: f32[2,1,128], index: 12, kind: input, shape index: {}]   ;;  %s5678_s13 = inlined_call_operand.vmem [shape: f32[1,128], index: 13, kind: input, shape index: {}]   ;;  %s5679_s14 = inlined_call_operand.vmem [shape: f32[1,128], index: 14, kind: input, shape index: {}]   ;;  %s5680_s15 = inlined_call_operand.hbm [shape: f32[2,8,128], index: 15, kind: output, shape index: {}]  }
   0x1   :  { %5694 = sst [smem:[#allocation19_spill]] %s5665_s0 }
   0x2   :  { %5695 = sst [smem:[#allocation20_spill]] %s5666_s1 }
   0x3   :  { %5696 = sst [smem:[#allocation21_spill]] %s5668_s3 }
   0x4   :  { %5697 = sst [smem:[#allocation22_spill]] %s5672_s7 }
   0x5   :  { %5698 = sst [smem:[#allocation23_spill]] %s5673_s8 }
   0x6   :  { %5699 = sst [smem:[#allocation24_spill]] %s5674_s9 }
   0x7   :  { %5700 = sst [smem:[#allocation25_spill]] %s5675_s10 }
   0x8   :  { %5701 = sst [smem:[#allocation26_spill]] %s5676_s11 }
   0x9   :  { %5702 = sst [smem:[#allocation27_spill]] %s5677_s12 }
   0xa   :  { %5703 = sst [smem:[#allocation28_spill]] %s5678_s13 }
   0xb   :  { %5704 = sst [smem:[#allocation29_spill]] %s5679_s14 }
   0xc   :  { %5705 = sst [smem:[#allocation30_spill]] %s5680_s15 }
   0xd   :  { %20 = vsyncpa [#allocation3], 0 }
   0xe   :  { %21 = vsyncpa [#allocation6], 0 }
   0xf   :  { %23 = vsyncpa [#allocation6 + $0x1], 0 }
  0x10   :  { %24 = vsyncpa [#allocation9], 0 }
  0x11   :  { %26 = vsyncpa [#allocation9 + $0x1], 0 }
  0x12   :  { %27 = vsyncpa [#allocation4], 0  ;;  %s4757_s18 = smov 0   ;;  %s4759_s19 = smov 0  }
  0x13   :  { %s4761_s20 = smov 0   ;;  %s4763_s21 = smov 0  }
  0x14 LB: > { %5706 = sst [smem:[#allocation16_spill]] %s4649_s20  ;;  %s4778_s22 = sadd.s32 1, %s4653_s21   ;;  %s4653_s21 = sphi %s4763_s21, %s5743_s21   ;;  %s4649_s20 = sphi %s4761_s20, %s5745_s20   ;;  %s4645_s19 = sphi %s4759_s19, %s5747_s19   ;;  %s4641_s18 = sphi %s4757_s18, %s5746_s18  }
  0x15   : > { %5707 = sst [smem:[#allocation17_spill]] %s4778_s22  ;;  %s61_s23 = sadd.s32 1, %s4649_s20 }
  0x16   : > { %s58_s24 = ssub.s32 %s4653_s21, %s4778_s22  ;;  %p68_p0 = scmp.ne.s32.totalorder %s4649_s20, %s4645_s19 }
  0x17   : > { %p59_p1 = scmp.eq.s32.totalorder %s58_s24, 0  ;;  %p69_p2 = scmp.eq.s32.totalorder %s4653_s21, 0 }
  0x18   : > { %p4238_p3 = scmp.lt.s32.totalorder %s4653_s21, 2  ;;  %s4792_s27 = sand.u32 1, %s4649_s20  }
  0x19   : > { %s4788_s25 = scalar_select %p59_p1, %s4649_s20, %s61_s23  }
  0x1a   : > { %p70_p4 = por %p69_p2, %p68_p0  ;;  %s4200_s28 = smul.u32 192, %s4792_s27 }
  0x1b   : > { %5708 = sst [smem:[#allocation18_spill]] %s4788_s25  ;;  %s4201_s30 = smul.u32 3072, %s4653_s21 }
  0x1c   : > { %p4795_p5 = pnand %p4238_p3, %p70_p4  ;;  %s5710_s1 = sld [smem:[#allocation20_spill]] }
  0x1d   : > { %s470_s23 = scalar_lea.vmem [#allocation5], %s4200_s28  ;;  %s5711_s25 = sand.u32 1, %s4653_s21  }
  0x1e   : > { %s5709_s29 = scalar_select %p4795_p5, 1, 0 }
  0x1f   : > { %s477_s26 = sshll.u32 %s470_s23, 4  ;;  %s4809_s20 = scalar_lea.sflag [#allocation6], %s5711_s25  ;;  %s4805_s26 = int_to_ptr.vmem [resolvable:$true] %s477_s26 }
  0x20   : > { %p4815_p7 = pneg %p4795_p5 }
  0x22   : > { %s4803_s24 = scalar_lea.hbm %s5710_s1, %s4201_s30  ;;  %s4438_s28 = scalar_lea.hbm %s5710_s1, 6144 }
  0x23   : > { %s4433_s22 = scalar_lea.hbm %s4803_s24, 3072  ;;  %p4439_p10 = scmp.lt.u32.totalorder %s4803_s24, %s5710_s1 }
  0x24   : > { %p4434_p6 = scmp.ne.s32.totalorder %s4803_s24, %s4433_s22  ;;  %p4440_p11 = scmp.lt.u32.totalorder %s4438_s28, %s4433_s22 }
  0x25   : > { %s5712_s15 = scalar_select %p4815_p7, 1, 0 }
  0x26   : > { %p4436_p8 = pnand %p4815_p7, %p4434_p6  ;;  %p4441_p12 = por %p4440_p11, %p4439_p10 }
  0x27   : > { %p4442_p13 = scmp.lt.u32.totalorder %s4433_s22, %s4803_s24 }
  0x28   : > { %p4437_p9 = pneg %p4436_p8 }
  0x29   : > { %p4443_p0 = por %p4442_p13, %p4441_p12 }
  0x2b   : > { %p4444_p1 = pnand %p4443_p0, %p4437_p9 }
  0x2d   : > { %4447 = shalt.err (!%p4444_p1)
}
  0x2e   : > { %s4448_s25 = scalar_lea.vmem %s4805_s26, 3072  ;;  %s4655_s30 = smov [#allocation5]  }
  0x2f   : > { %p4449_p2 = scmp.ne.s32.totalorder %s4805_s26, %s4448_s25  ;;  %s4453_s16 = sshll.u32 %s4655_s30, 4  ;;  %s4454_s16 = int_to_ptr.vmem [resolvable:$false] %s4453_s16 }
  0x30   : > { %s4455_s17 = scalar_lea.vmem %s4454_s16, 6144  ;;  %p4456_p6 = scmp.lt.s32.totalorder %s4805_s26, %s4454_s16 }
  0x31   : > { %p4451_p3 = pnand %p4449_p2, %p4815_p7  ;;  %p4457_p8 = scmp.lt.s32.totalorder %s4455_s17, %s4448_s25 }
  0x33   : > { %p4452_p4 = pneg %p4451_p3  ;;  %p4458_p10 = por %p4457_p8, %p4456_p6 }
  0x35   : > { %p4459_p11 = pnand %p4458_p10, %p4452_p4 }
  0x37   : > { %4462 = shalt.err (!%p4459_p11)
}
  0x38   : > { %s4656_s22 = smov 192   ;;  %s4657_s28 = smov 12  }
  0x39   : > { %4227 = dma.hbm_to_vmem [thread:$0]  (!%p4795_p5), %s4803_s24, 3072, %s4805_s26, %s4809_s20, %s4656_s22, %s4656_s22, %s4657_s28  }
  0x3a   : > { %s3866_s23 = sshll.u32 %s4792_s27, 7  ;;  %s3990_s30 = sshll.u32 %s4653_s21, 11 }
  0x3b   : > { %s5713_s9 = sld [smem:[#allocation24_spill]]  ;;  %s549_s1 = scalar_lea.vmem [#allocation8], %s3866_s23 }
  0x3c   : > { %s556_s14 = sshll.u32 %s549_s1, 4  ;;  %s5714_s13 = sand.u32 1, %s4653_s21   ;;  %s4850_s14 = int_to_ptr.vmem [resolvable:$true] %s556_s14 }
  0x3d   : > { %s4854_s12 = scalar_lea.sflag [#allocation9], %s5714_s13 }
  0x41   : > { %s4846_s17 = scalar_lea.hbm %s5713_s9, %s3990_s30  ;;  %s4468_s28 = scalar_lea.hbm %s5713_s9, 4096 }
  0x42   : > { %s4463_s26 = scalar_lea.hbm %s4846_s17, 2048  ;;  %p4469_p0 = scmp.lt.u32.totalorder %s4846_s17, %s5713_s9 }
  0x43   : > { %p4464_p9 = scmp.ne.s32.totalorder %s4846_s17, %s4463_s26  ;;  %p4470_p1 = scmp.lt.u32.totalorder %s4468_s28, %s4463_s26 }
  0x44   : > { %p4472_p3 = scmp.lt.u32.totalorder %s4463_s26, %s4846_s17 }
  0x45   : > { %p4466_p12 = pnand %p4464_p9, %p4815_p7  ;;  %p4471_p2 = por %p4470_p1, %p4469_p0 }
  0x47   : > { %p4467_p13 = pneg %p4466_p12  ;;  %p4473_p4 = por %p4472_p3, %p4471_p2 }
  0x49   : > { %p4474_p6 = pnand %p4473_p4, %p4467_p13 }
  0x4b   : > { %4477 = shalt.err (!%p4474_p6)
}
  0x4c   : > { %s4478_s1 = scalar_lea.vmem %s4850_s14, 2048  ;;  %s4658_s13 = smov [#allocation8]  }
  0x4d   : > { %p4479_p8 = scmp.ne.s32.totalorder %s4850_s14, %s4478_s1  ;;  %s4483_s24 = sshll.u32 %s4658_s13, 4  ;;  %s4484_s24 = int_to_ptr.vmem [resolvable:$false] %s4483_s24 }
  0x4e   : > { %s4485_s22 = scalar_lea.vmem %s4484_s24, 4096  ;;  %p4486_p9 = scmp.lt.s32.totalorder %s4850_s14, %s4484_s24 }
  0x4f   : > { %p4481_p10 = pnand %p4479_p8, %p4815_p7  ;;  %p4487_p12 = scmp.lt.s32.totalorder %s4485_s22, %s4478_s1 }
  0x51   : > { %p4482_p11 = pneg %p4481_p10  ;;  %p4488_p0 = por %p4487_p12, %p4486_p9 }
  0x53   : > { %p4489_p1 = pnand %p4488_p0, %p4482_p11 }
  0x55   : > { %4492 = shalt.err (!%p4489_p1)
}
  0x56   : > { %s5685_s26 = smov 128   ;;  %s5686_s28 = smov 8  }
  0x57   : > { %4233 = dma.hbm_to_vmem [thread:$0]  (!%p4795_p5), %s4846_s17, 2048, %s4850_s14, %s4854_s12, %s5685_s26, %s5685_s26, %s5686_s28  }
  0x58   : > { %s5715_s11 = sld [smem:[#allocation26_spill]]  ;;  %s577_s13 = scalar_lea.vmem [#allocation10], %s3866_s23 }
  0x59   : > { %s584_s24 = sshll.u32 %s577_s13, 4  ;;  %s4893_s22 = sadd.s32 4294967295, %s4653_s21   ;;  %s4890_s24 = int_to_ptr.vmem [resolvable:$true] %s584_s24 }
  0x5a   : > { %p74_p13 = scmp.ne.s32.totalorder %s4645_s19, %s4641_s18  ;;  %p5687_p2 = scmp.eq.s32.totalorder %s4893_s22, 0 }
  0x5b   : > { %p3859_p3 = scmp.ge.s32.totalorder %s4653_s21, 1  ;;  %p434_p4 = scmp.lt.s32.totalorder %s4653_s21, 3 }
  0x5c   : > { %p4902_p6 = por %p5687_p2, %p74_p13  ;;  %s3863_s25 = sshll.u32 %s4792_s27, 6 }
  0x5d   : > { %p4907_p10 = pnand %p3859_p3, %p434_p4  ;;  %s3989_s18 = sshll.u32 %s4653_s21, 10 }
  0x5e   : > { %s4886_s1 = scalar_lea.hbm %s5715_s11, %s3990_s30  ;;  %s4661_s30 = smov [#allocation2]  }
  0x5f   : > { %s5716_s14 = scalar_select %p4902_p6, 1, 0 }
  0x60   : > { %s5717_s23 = scalar_select %p4907_p10, 1, 0 }
  0x61   : > { %s446_s17 = sshll.u32 %s4661_s30, 4  ;;  %p4220_p11 = pneg %p4907_p10  ;;  %s447_s17 = int_to_ptr.vmem [resolvable:$true] %s446_s17 }
  0x62   : > { %s5719_s3 = sld [smem:[#allocation21_spill]]  ;;  %s498_s9 = scalar_lea.vmem [#allocation7], %s3863_s25 }
  0x63   : > { %p4917_p9 = pnand %p4220_p11, %p5687_p2  ;;  %s505_s10 = sshll.u32 %s498_s9, 4  ;;  %s4926_s10 = int_to_ptr.vmem [resolvable:$true] %s505_s10 }
  0x64   : > { %s5720_s0 = sld [smem:[#allocation19_spill]] }
  0x65   : > { %p4495_p0 = pneg %p4917_p9 }
  0x68   : > { %s4924_s28 = scalar_lea.hbm %s5719_s3, %s3989_s18 }
  0x6a   : > { %s4493_s8 = scalar_lea.hbm %s5720_s0, 256 }
  0x6b   : > { %p4494_p12 = scmp.ne.s32.totalorder %s5720_s0, %s4493_s8  ;;  %p4500_p3 = scmp.lt.u32.totalorder %s4493_s8, %s5720_s0 }
  0x6d   : > { %p4496_p1 = pnand %p4495_p0, %p4494_p12 }
  0x6f   : > { %p4497_p13 = pneg %p4496_p1 }
  0x71   : > { %p4502_p4 = pnand %p4500_p3, %p4497_p13 }
  0x73   : > { %4505 = shalt.err (!%p4502_p4)
}
  0x74   : > { %s4506_s9 = scalar_lea.vmem %s447_s17, 256  ;;  %p4514_p6 = scmp.lt.s32.totalorder %s447_s17, %s447_s17 }
  0x75   : > { %p4507_p11 = scmp.ne.s32.totalorder %s447_s17, %s4506_s9  ;;  %p4515_p10 = scmp.lt.s32.totalorder %s4506_s9, %s4506_s9 }
  0x77   : > { %p4509_p8 = pnand %p4507_p11, %p4495_p0  ;;  %p4516_p5 = por %p4515_p10, %p4514_p6 }
  0x79   : > { %p4510_p2 = pneg %p4509_p8 }
  0x7b   : > { %p4517_p7 = pnand %p4516_p5, %p4510_p2 }
  0x7d   : > { %4520 = shalt.err (!%p4517_p7)
}
  0x7e   : > { %s5721_s7 = smov 8   ;;  %s5722_s25 = smov 128  }
  0x7f   : > { %4223 = dma.hbm_to_vmem [thread:$0]  (!%p4917_p9), %s5720_s0, 256, %s447_s17, [#allocation3], %s5722_s25, %s5722_s25, %s5721_s7  }
  0x80   : > { %s4521_s8 = scalar_lea.hbm %s4924_s28, 1024  ;;  %p5723_p12 = scmp.ne.s32.totalorder %s5712_s15, 0 }
  0x81   : > { %p4522_p8 = scmp.ne.s32.totalorder %s4924_s28, %s4521_s8  ;;  %s4526_s16 = scalar_lea.hbm %s5719_s3, 2048 }
  0x82   : > { %p4527_p7 = scmp.lt.u32.totalorder %s4924_s28, %s5719_s3  ;;  %p4528_p2 = scmp.lt.u32.totalorder %s4526_s16, %s4521_s8 }
  0x83   : > { %p4524_p6 = pnand %p4522_p8, %p5723_p12  ;;  %p4530_p0 = scmp.lt.u32.totalorder %s4521_s8, %s4924_s28 }
  0x84   : > { %p4529_p10 = por %p4528_p2, %p4527_p7 }
  0x85   : > { %p4525_p5 = pneg %p4524_p6 }
  0x86   : > { %p4531_p1 = por %p4530_p0, %p4529_p10 }
  0x88   : > { %p4532_p13 = pnand %p4531_p1, %p4525_p5 }
  0x8a   : > { %4535 = shalt.err (!%p4532_p13)
}
  0x8b   : > { %s4536_s17 = scalar_lea.vmem %s4926_s10, 1024  ;;  %s4662_s9 = smov [#allocation7]  }
  0x8c   : > { %p4537_p9 = scmp.ne.s32.totalorder %s4926_s10, %s4536_s17  ;;  %s4541_s7 = sshll.u32 %s4662_s9, 4  ;;  %s4542_s7 = int_to_ptr.vmem [resolvable:$false] %s4541_s7 }
  0x8d   : > { %s4543_s25 = scalar_lea.vmem %s4542_s7, 2048  ;;  %p4544_p11 = scmp.lt.s32.totalorder %s4926_s10, %s4542_s7 }
  0x8e   : > { %p4539_p3 = pnand %p4537_p9, %p5723_p12  ;;  %p4545_p8 = scmp.lt.s32.totalorder %s4543_s25, %s4536_s17 }
  0x90   : > { %p4540_p4 = pneg %p4539_p3  ;;  %p4546_p6 = por %p4545_p8, %p4544_p11 }
  0x92   : > { %p4547_p7 = pnand %p4546_p6, %p4540_p4 }
  0x94   : > { %4550 = shalt.err (!%p4547_p7)
}
  0x95   : > { %s4663_s18 = smov 64   ;;  %s4664_s27 = smov 4  }
  0x96   : > { %p5724_p5 = scmp.ne.s32.totalorder %s5709_s29, 0  ;;  %s4551_s8 = scalar_lea.hbm %s4886_s1, 2048 }
  0x97   : > { %p4552_p2 = scmp.ne.s32.totalorder %s4886_s1, %s4551_s8  ;;  %s4556_s16 = scalar_lea.hbm %s5715_s11, 4096 }
  0x98   : > { %4230 = dma.hbm_to_vmem [thread:$0]  (!%p5724_p5), %s4924_s28, 1024, %s4926_s10, %s4809_s20, %s4663_s18, %s4663_s18, %s4664_s27  }
  0x99   : > { %p4554_p10 = pnand %p4552_p2, %p5723_p12  ;;  %p4557_p1 = scmp.lt.u32.totalorder %s4886_s1, %s5715_s11 }
  0x9a   : > { %p4558_p13 = scmp.lt.u32.totalorder %s4556_s16, %s4551_s8  ;;  %p4560_p3 = scmp.lt.u32.totalorder %s4551_s8, %s4886_s1 }
  0x9b   : > { %p4555_p0 = pneg %p4554_p10 }
  0x9c   : > { %p4559_p9 = por %p4558_p13, %p4557_p1 }
  0x9e   : > { %p4561_p4 = por %p4560_p3, %p4559_p9 }
  0xa0   : > { %p4562_p11 = pnand %p4561_p4, %p4555_p0 }
  0xa2   : > { %4565 = shalt.err (!%p4562_p11)
}
  0xa3   : > { %s4566_s10 = scalar_lea.vmem %s4890_s24, 2048  ;;  %s4665_s20 = smov [#allocation10]  }
  0xa4   : > { %p4567_p8 = scmp.ne.s32.totalorder %s4890_s24, %s4566_s10  ;;  %s4571_s28 = sshll.u32 %s4665_s20, 4  ;;  %s4572_s28 = int_to_ptr.vmem [resolvable:$false] %s4571_s28 }
  0xa5   : > { %s4573_s17 = scalar_lea.vmem %s4572_s28, 4096  ;;  %p4574_p2 = scmp.lt.s32.totalorder %s4890_s24, %s4572_s28 }
  0xa6   : > { %p4569_p6 = pnand %p4567_p8, %p5723_p12  ;;  %p4575_p10 = scmp.lt.s32.totalorder %s4573_s17, %s4566_s10 }
  0xa8   : > { %p4570_p7 = pneg %p4569_p6  ;;  %p4576_p1 = por %p4575_p10, %p4574_p2 }
  0xaa   : > { %p4577_p13 = pnand %p4576_p1, %p4570_p7 }
  0xac   : > { %4580 = shalt.err (!%p4577_p13)
}
  0xad   : > { %4236 = dma.hbm_to_vmem [thread:$0]  (!%p5724_p5), %s4886_s1, 2048, %s4890_s24, %s4854_s12, %s4663_s18, %s4663_s18, %s4664_s27  }
  0xae   : > { %p5725_p12 = scmp.ne.s32.totalorder %s5717_s23, 0 }
  0xaf   : > { %p5726_p0 = scmp.eq.s32.totalorder (!%p5725_p12), %s4893_s22, 0 }
  0xb0   : > { %602 = sbr.rel (%p5725_p12) target bundleno = 3224 (0xc98), region = 80 }
  0xb7   : > { %4624 = dma.done.wait (%p5726_p0), [#allocation3], 256   ;;  %p5727_p9 = pmov %p5726_p0 }
  0xb8   : > { %s608_s15 = sand.u32 1, %s4893_s22   ;;  %s610_s29 = sand.u32 1, %s4645_s19  }
  0xb9   : > { %4626 = vsyncadd (%p5727_p9), [#allocation3], 4294967040  ;;  %s4202_s9 = smul.u32 192, %s610_s29  ;;  %s609_s7 = scalar_lea.sflag [#allocation6], %s608_s15 }
  0xba   : > { %p5728_p3 = scmp.ne.s32.totalorder %s5716_s14, 0 }
  0xbb   : > { %s5005_s25 = scalar_lea.vmem [#allocation5], %s4202_s9 }
  0xbc   : > { %4628 = dma.done.wait (%p5728_p3), %s609_s7, 4096  }
  0xbd   : > { %4630 = vsyncadd (%p5728_p3), %s609_s7, 4294963200  ;;  %s3874_s12 = sshll.u32 %s610_s29, 6  ;;  %s3875_s1 = sshll.u32 %s610_s29, 7 }
  0xbe   : > { %s5011_s24 = scalar_lea.vmem [#allocation7], %s3874_s12  ;;  %s627_s23 = scalar_lea.sflag [#allocation9], %s608_s15 }
  0xbf   : > { %s5013_s18 = scalar_lea.vmem [#allocation8], %s3875_s1 }
  0xc0   : > { %4632 = dma.done.wait (%p5728_p3), %s627_s23, 4096  }
  0xc1   : > { %4634 = vsyncadd (%p5728_p3), %s627_s23, 4294963200  ;;  %p722_p5 = scmp.lt.s32.totalorder %s4893_s22, 1  ;;  %s5729_s12 = sld [smem:[#allocation22_spill]] }
  0xc2   : > { %s5730_s21 = sld [smem:[#allocation23_spill]]  ;;  %s5731_s13 = sld [smem:[#allocation25_spill]] }
  0xc3   : > { %s5021_s27 = scalar_select %p722_p5, %s4893_s22, 1 }
  0xc4   : > { %s5732_s28 = sld [smem:[#allocation27_spill]]  ;;  %p5733_p4 = scmp.ne.s32.totalorder %s4893_s22, 0 }
  0xc5   : > { %s4203_s8 = smul.u32 3, %s5021_s27  ;;  %s3877_s3 = sshll.u32 %s5021_s27, 1  ;;  %v753_v0 = vld [vmem:[#allocation2] sm:$0xff] (!%p5733_p4)  ;;  %v754_v1 = vld [vmem:[#allocation2 + $0x8] sm:$0xff] (!%p5733_p4) }
  0xc6   : > { %752 = sbr.rel (%p5733_p4) target bundleno = 205 (0xcd), region = 104  ;;  %755 = vst [vmem:[#allocation11] sm:$0xff] (!%p5733_p4), %v753_v0  ;;  %756 = vst [vmem:[#allocation11 + $0x8] sm:$0xff] (!%p5733_p4), %v754_v1 }
  0xc7   : > { %s5039_s29 = scalar_lea.vmem %s5667_s2, %s4203_s8  ;;  %s737_s23 = scalar_lea.vmem %s5729_s12, %s5021_s27 }
  0xc8   : > { %s740_s16 = scalar_lea.vmem %s5730_s21, %s5021_s27  ;;  %s5053_s11 = scalar_lea.vmem %s5731_s13, %s3877_s3 }
  0xc9   : > { %s5059_s8 = scalar_lea.vmem [#allocation10], %s3875_s1 }
  0xca   : > { %s747_s17 = scalar_lea.vmem %s5732_s28, %s5021_s27 }
  0xcd PF: > { %v757_v2 = vld [vmem:[#allocation11] sm:$0xff]  ;;  %v758_v3 = vld [vmem:[#allocation11 + $0x8] sm:$0xff]  ;;  %v4666_v6 = vmov 0.0   ;;  %v4317_v20 = vld [vmem:[%s5005_s25 + $0x30] ss:$12 sps:$4 sm:$0xff]   ;;  %v4667_v32 = vmov 0   ;;  %s5735_s28 = scalar_lea.vmem %s5671_s6, %s5021_s27  ;;  %v835_v55 = vlaneseq  ;;  %s5736_s12 = scalar_lea.vmem %s5669_s4, %s5021_s27 }
  0xce   : > { %761 = vadd.xlane.f32.xlu0 %v757_v2  ;;  %v4307_v4 = vld [vmem:[%s5005_s25 + $0x4] ss:$12 sps:$4 sm:$0xff]   ;;  %v4309_v5 = vld [vmem:[%s5005_s25] ss:$12 sps:$4 sm:$0xff]   ;;  %4064 = vmatprep.subr.bf16.mxu1 %v4666_v6  ;;  %v4310_v7 = vld [vmem:[%s5005_s25 + $0x8] ss:$12 sps:$4 sm:$0xff]  }
  0xcf   : > { %v4311_v8 = vld [vmem:[%s5005_s25 + $0x1c] ss:$12 sps:$4 sm:$0xff]   ;;  %978 = vmatprep.subr.bf16.mxu0 %v4307_v4  ;;  %4065 = vmatpush3.bf16.msra.mxu1 %v4310_v7  ;;  %v4313_v17 = vld [vmem:[%s5005_s25 + $0x18] ss:$12 sps:$4 sm:$0xff]   ;;  %v4314_v18 = vld [vmem:[%s5005_s25 + $0x20] ss:$12 sps:$4 sm:$0xff]  }
  0xd0   : > { %979 = vmatpush1.bf16.msra.mxu0 %v4309_v5  ;;  %4066 = vmatprep.subr.bf16.mxu1 %v4666_v6  ;;  %v4315_v19 = vld [vmem:[%s5005_s25 + $0x34] ss:$12 sps:$4 sm:$0xff]   ;;  %v4318_v21 = vld [vmem:[%s5005_s25 + $0x38] ss:$12 sps:$4 sm:$0xff]   ;;  %v4322_v24 = vld [vmem:[%s5005_s25 + $0x50] ss:$12 sps:$4 sm:$0xff]  }
  0xd1   : > { %980 = vmatprep.subr.bf16.mxu0 %v4311_v8  ;;  %v4319_v22 = vld [vmem:[%s5005_s25 + $0x4c] ss:$12 sps:$4 sm:$0xff]   ;;  %v4321_v23 = vld [vmem:[%s5005_s25 + $0x48] ss:$12 sps:$4 sm:$0xff]   ;;  %v4323_v25 = vld [vmem:[%s5005_s25 + $0x64] ss:$12 sps:$4 sm:$0xff]   ;;  %1010 = vmatprep.mubr.bf16.mxu0 %v4667_v32 }
  0xd2   : > { %763 = vadd.xlane.f32.xlu0 %v758_v3  ;;  %v4325_v26 = vld [vmem:[%s5005_s25 + $0x60] ss:$12 sps:$4 sm:$0xff]   ;;  %v4326_v27 = vld [vmem:[%s5005_s25 + $0x68] ss:$12 sps:$4 sm:$0xff]   ;;  %v4329_v29 = vld [vmem:[%s5005_s25 + $0x78] ss:$12 sps:$4 sm:$0xff]  }
  0xd3   : > { %4067 = vmatpush3.bf16.msra.mxu1 %v4314_v18  ;;  %v4327_v28 = vld [vmem:[%s5005_s25 + $0x7c] ss:$12 sps:$4 sm:$0xff]   ;;  %v4330_v30 = vld [vmem:[%s5005_s25 + $0x80] ss:$12 sps:$4 sm:$0xff]   ;;  %vm4668_vm0 = vmmov 0   ;;  %v5124_v56 = vshrl.u32 %v835_v55, 7 }
  0xd4   : > { %981 = vmatpush1.bf16.msra.mxu0 %v4313_v17  ;;  %4068 = vmatprep.subr.bf16.mxu1 %v4666_v6  ;;  %v4331_v31 = vld [vmem:[%s5005_s25 + $0x94] ss:$12 sps:$4 sm:$0xff]   ;;  %v4333_v33 = vld [vmem:[%s5005_s25 + $0x90] ss:$12 sps:$4 sm:$0xff]   ;;  %v4334_v34 = vld [vmem:[%s5005_s25 + $0x98] ss:$12 sps:$4 sm:$0xff]  }
  0xd5   : > { %982 = vmatprep.subr.bf16.mxu0 %v4315_v19  ;;  %4080 = vmatprep.mubr.msk.bf16.mxu1 %vm4668_vm0, %v4666_v6  ;;  %v4335_v35 = vld [vmem:[%s5005_s25 + $0xac] ss:$12 sps:$4 sm:$0xff]   ;;  %v4337_v36 = vld [vmem:[%s5005_s25 + $0xa8] ss:$12 sps:$4 sm:$0xff]   ;;  %v4338_v37 = vld [vmem:[%s5005_s25 + $0xb0] ss:$12 sps:$4 sm:$0xff]   ;;  %s5734_s25 = scalar_lea.vmem %s5670_s5, %s5021_s27 }
  0xd6   : > { %v3879_v46 = vld [vmem:[%s5734_s25] ss:$0 sm:$0xff]  ;;  %v841_v57 = vsub.s32 1, %v5124_v56  ;;  %v837_v59 = vsub.s32 0, %v5124_v56  ;;  %s4669_s15 = smov 64   ;;  %s4671_s9 = smov 32  }
  0xd7   : > { %4069 = vmatpush3.bf16.msra.mxu1 %v4318_v21  ;;  %v3880_v50 = vld [vmem:[%s5735_s28] ss:$0 sm:$0xff]  ;;  %vm1954_vm1 = vcmask 261120   ;;  %vm2323_vm2 = vcmask 64512   ;;  %vm2431_vm3 = vcmask 1043456   ;;  %vm3095_vm4 = vcmask 523264  }
  0xd8   : > { %983 = vmatpush1.bf16.msra.mxu0 %v4317_v20  ;;  %4070 = vmatprep.subr.bf16.mxu1 %v4666_v6  ;;  %v5128_v58 = vld [vmem:[%s5039_s29] sm:$0x7]  ;;  %s4670_s29 = smov 96   ;;  %vm3098_vm5 = vcmask 785408   ;;  %p3981_p11 = scmp.ge.s32.totalorder %s4893_s22, 1 }
  0xd9   : > { %984 = vmatprep.subr.bf16.mxu0 %v4319_v22  ;;  %v842_v60 = vrot.slane %v5128_v58, %v841_v57  ;;  %v838_v1 = vrot.slane %v5128_v58, %v837_v59 }
  0xdb   : > { %4071 = vmatpush3.bf16.msra.mxu1 %v4322_v24 }
  0xdc   : > { %985 = vmatpush1.bf16.msra.mxu0 %v4321_v23  ;;  %4072 = vmatprep.subr.bf16.mxu1 %v4666_v6 }
  0xdd   : > { %986 = vmatprep.subr.bf16.mxu0 %v4323_v25 }
  0xdf   : > { %4073 = vmatpush3.bf16.msra.mxu1 %v4326_v27 }
  0xe0   : > { %987 = vmatpush1.bf16.msra.mxu0 %v4325_v26  ;;  %4074 = vmatprep.subr.bf16.mxu1 %v4666_v6 }
  0xe1   : > { %988 = vmatprep.subr.bf16.mxu0 %v4327_v28 }
  0xe3   : > { %4075 = vmatpush3.bf16.msra.mxu1 %v4330_v30 }
  0xe4   : > { %989 = vmatpush1.bf16.msra.mxu0 %v4329_v29  ;;  %4076 = vmatprep.subr.bf16.mxu1 %v4666_v6 }
  0xe5   : > { %990 = vmatprep.subr.bf16.mxu0 %v4331_v31 }
  0xe7   : > { %4077 = vmatpush3.bf16.msra.mxu1 %v4334_v34 }
  0xe8   : > { %991 = vmatpush1.bf16.msra.mxu0 %v4333_v33  ;;  %4078 = vmatprep.subr.bf16.mxu1 %v4666_v6 }
  0xe9   : > { %992 = vmatprep.subr.bf16.mxu0 %v4335_v35 }
  0xeb   : > { %4079 = vmatpush3.bf16.msra.mxu1 %v4338_v37 }
  0xec   : > { %993 = vmatpush1.bf16.msra.mxu0 %v4337_v36  ;;  %4084 = vmatprep.subr.bf16.mxu1 %v4666_v6 }
  0xed   : > { %4108 = vmatprep.subr.bf16.mxu0 %v4666_v6 }
 0x15b   : > { %v762_v9 = vpop.xlane.xlu0 %761 }
 0x15c   : > { %v766_v10 = vmul.f32 0.0078125, %v762_v9 }
 0x15e   : > { %v5069_v11 = vsub.f32 %v757_v2, %v766_v10 }
 0x15f   : > { %v764_v12 = vpop.xlane.xlu0 %763 }
 0x160   : > { %v767_v13 = vmul.f32 0.0078125, %v764_v12  ;;  %v770_v14 = vmul.f32 %v5069_v11, %v5069_v11 }
 0x162   : > { %v5073_v15 = vsub.f32 %v758_v3, %v767_v13  ;;  %772 = vadd.xlane.f32.xlu1 %v770_v14  ;;  %v4673_v13 = vmov 1934713408  }
 0x163   : > { %v1117_v14 = vunpack.c.l.s4 %v4673_v13 }
 0x164   : > { %v771_v16 = vmul.f32 %v5073_v15, %v5073_v15 }
 0x165   : > { %v1118_v18 = vunpack.c.0.s8 %v1117_v14 }
 0x166   : > { %774 = vadd.xlane.f32.xlu1 %v771_v16 }
 0x167   : > { %v5167_v26 = vsub.s32 %v1118_v18, %v5124_v56 }
 0x1ef   : > { %v773_v38 = vpop.xlane.xlu1 %772 }
 0x1f0   : > { %v776_v39 = vmul.f32 0.0078125, %v773_v38 }
 0x1f2   : > { %v778_v40 = vadd.f32 1e-05, %v776_v39 }
 0x1f3   : > { %v775_v41 = vpop.xlane.xlu1 %774 }
 0x1f4   : > { %4387 = vrsqrt.f32 %v778_v40  ;;  %v777_v42 = vmul.f32 0.0078125, %v775_v41 }
 0x1f6   : > { %v779_v43 = vadd.f32 1e-05, %v777_v42 }
 0x1f8   : > { %4389 = vrsqrt.f32 %v779_v43 }
 0x1fe   : > { %v4388_v44 = vpop.eup %4387 }
 0x1ff   : > { %v782_v45 = vmul.f32 %v4388_v44, %v5069_v11  ;;  %v4672_v11 = vmov 1983009808  }
 0x200   : > { %v1085_v12 = vunpack.c.l.s4 %v4672_v11 }
 0x201   : > { %v790_v49 = vmul.f32 %v3879_v46, %v782_v45 }
 0x202   : > { %v4390_v47 = vpop.eup %4389 }
 0x203   : > { %v783_v48 = vmul.f32 %v4390_v47, %v5073_v15  ;;  %v798_v52 = vadd.f32 %v3880_v50, %v790_v49  ;;  %v1086_v15 = vunpack.c.0.s8 %v1085_v12 }
 0x205   : > { %v791_v51 = vmul.f32 %v3879_v46, %v783_v48  ;;  %v5164_v19 = vsub.s32 %v1086_v15, %v5124_v56 }
 0x207   : > { %v799_v53 = vadd.f32 %v3880_v50, %v791_v51 }
 0x209   : > { %v800_v54 = vpack.c.bf16 %v799_v53, %v798_v52 }
 0x20b   : > { %1011 = vmatmul.mubr.bf16.vlgmr.msra.gmra.mrb[0].mxu0 %v800_v54  ;;  %4081 = vmatmul.mubr.bf16.vlgmr.msra.gmra.mrb[0].mxu1 %v800_v54 }
 0x20c   : > { %4086 = vmatprep.mubr.msk.bf16.mxu1 %vm4668_vm0, %v4666_v6  ;;  %4110 = vmatprep.mubr.msk.bf16.mxu0 %vm4668_vm0, %v4666_v6 }
 0x2de   : > { %v1012_v61 = vpop.f32.mrb[0].mxu0  ;;  %v5134_v62 = vpop.f32.mrb[0].mxu1 }
 0x2df   : > { %v1014_v63 = vpop.f32.mrb[1].mxu0  ;;  %v4082_v0 = vpop.f32.mrb[1].mxu1  ;;  %v1013_v8 = vadd.f32 %v1012_v61, %v838_v1 }
 0x2e0   : > { %v1015_v2 = vadd.f32 %v1014_v63, %v842_v60  ;;  %v1016_v3 = vpop.f32.mrb[2].mxu0  ;;  %v5139_v4 = vpop.f32.mrb[2].mxu1 }
 0x2e1   : > { %v1018_v5 = vpop.f32.mrb[3].mxu0  ;;  %v4083_v7 = vpop.f32.mrb[3].mxu1  ;;  %v5153_v10 = vadd.f32 %v1016_v3, %v838_v1 }
 0x2e2   : > { %1362 = vrot.lane.b32.xlu1 %v1015_v2, %s4669_s15  ;;  %1356 = vrot.lane.b32.xlu0 %v1015_v2, %s4670_s29  ;;  %v5145_v9 = vadd.f32 %v1018_v5, %v842_v60 }
 0x2e6   : > { %1368 = vrot.lane.b32.xlu1 %v1015_v2, %s4671_s9  ;;  %1070 = vrot.lane.b32.xlu0 %v1013_v8, %s4669_s15 }
 0x2ea   : > { %1358 = vrot.lane.b32.xlu0 %v5145_v9, %s4670_s29  ;;  %1064 = vrot.lane.b32.xlu1 %v1013_v8, %s4670_s29 }
 0x2ee   : > { %1370 = vrot.lane.b32.xlu0 %v5145_v9, %s4671_s9  ;;  %1076 = vrot.lane.b32.xlu1 %v1013_v8, %s4671_s9 }
 0x2f2   : > { %1072 = vrot.lane.b32.xlu0 %v5153_v10, %s4669_s15  ;;  %1364 = vrot.lane.b32.xlu1 %v5145_v9, %s4669_s15 }
 0x2f6   : > { %1066 = vrot.lane.b32.xlu1 %v5153_v10, %s4670_s29 }
 0x2fa   : > { %1078 = vrot.lane.b32.xlu1 %v5153_v10, %s4671_s9 }
 0x354   : > { %v1363_v16 = vpop.permute.xlu1 %1362  ;;  %v1357_v17 = vpop.permute.xlu0 %1356 }
 0x355   : > { %v1374_v20 = vcombine.low %v1015_v2, %v1363_v16  ;;  %v1375_v21 = vcombine.high %v1015_v2, %v1363_v16 }
 0x357   : > { %v1382_v27 = vrot.slane %v1374_v20, %v5164_v19  ;;  %v1389_v28 = vrot.slane %v1375_v21, %v5164_v19 }
 0x358   : > { %v1369_v22 = vpop.permute.xlu1 %1368  ;;  %v1071_v23 = vpop.permute.xlu0 %1070 }
 0x359   : > { %v1390_v24 = vcombine.low %v1357_v17, %v1369_v22  ;;  %v1391_v25 = vcombine.high %v1357_v17, %v1369_v22  ;;  %v1082_v38 = vcombine.low %v1013_v8, %v1071_v23  ;;  %v1083_v39 = vcombine.high %v1013_v8, %v1071_v23 }
 0x35b   : > { %v1398_v29 = vrot.slane %v1390_v24, %v5164_v19  ;;  %v1405_v30 = vrot.slane %v1391_v25, %v5164_v19  ;;  %v1090_v60 = vrot.slane %v1082_v38, %v5164_v19  ;;  %v1097_v61 = vrot.slane %v1083_v39, %v5164_v19 }
 0x35c   : > { %v1359_v31 = vpop.permute.xlu0 %1358  ;;  %v1065_v33 = vpop.permute.xlu1 %1064 }
 0x35d   : > { %v1406_v34 = vcombine.low %v1382_v27, %v1398_v29  ;;  %v1407_v35 = vcombine.high %v1382_v27, %v1398_v29  ;;  %v1422_v36 = vcombine.low %v1389_v28, %v1405_v30  ;;  %v1423_v37 = vcombine.high %v1389_v28, %v1405_v30 }
 0x35f   : > { %v1414_v40 = vrot.slane %v1406_v34, %v5167_v26  ;;  %v1421_v41 = vrot.slane %v1407_v35, %v5167_v26  ;;  %v1430_v42 = vrot.slane %v1422_v36, %v5167_v26  ;;  %v1437_v43 = vrot.slane %v1423_v37, %v5167_v26 }
 0x360   : > { %v1371_v44 = vpop.permute.xlu0 %1370  ;;  %v1077_v45 = vpop.permute.xlu1 %1076 }
 0x361   : > { %v1510_v46 = vcombine.low %v1414_v40, %v1421_v41  ;;  %v3909_v47 = vcombine.high %v1414_v40, %v1421_v41  ;;  %v1526_v48 = vcombine.low %v1430_v42, %v1437_v43  ;;  %v3910_v49 = vcombine.high %v1430_v42, %v1437_v43 }
 0x362   : > { %v1458_v50 = vcombine.low %v1359_v31, %v1371_v44  ;;  %v1459_v51 = vcombine.high %v1359_v31, %v1371_v44  ;;  %v1098_v52 = vcombine.low %v1065_v33, %v1077_v45  ;;  %v1099_v53 = vcombine.high %v1065_v33, %v1077_v45 }
 0x363   : > { %v5178_v54 = vrot.slane %v1510_v46, %v5164_v19  ;;  %v5181_v55 = vrot.slane %v3909_v47, %v5164_v19  ;;  %v5186_v63 = vrot.slane %v1526_v48, %v5164_v19  ;;  %v5189_v0 = vrot.slane %v3910_v49, %v5164_v19 }
 0x364   : > { %v1106_v1 = vrot.slane %v1098_v52, %v5164_v19  ;;  %v1113_v2 = vrot.slane %v1099_v53, %v5164_v19  ;;  %v1073_v3 = vpop.permute.xlu0 %1072  ;;  %v1365_v5 = vpop.permute.xlu1 %1364  ;;  %v1466_v7 = vrot.slane %v1458_v50, %v5164_v19  ;;  %v1473_v8 = vrot.slane %v1459_v51, %v5164_v19 }
 0x365   : > { %v1442_v11 = vcombine.low %v5145_v9, %v1365_v5  ;;  %v1443_v12 = vcombine.high %v5145_v9, %v1365_v5  ;;  %v1150_v17 = vcombine.low %v5153_v10, %v1073_v3  ;;  %v1151_v18 = vcombine.high %v5153_v10, %v1073_v3 }
 0x366   : > { %v1114_v13 = vcombine.low %v1090_v60, %v1106_v1  ;;  %v1115_v14 = vcombine.high %v1090_v60, %v1106_v1  ;;  %v1130_v15 = vcombine.low %v1097_v61, %v1113_v2  ;;  %v1131_v16 = vcombine.high %v1097_v61, %v1113_v2 }
 0x367   : > { %v1450_v20 = vrot.slane %v1442_v11, %v5164_v19  ;;  %v1457_v21 = vrot.slane %v1443_v12, %v5164_v19  ;;  %v1542_v1 = vcombine.low %v5178_v54, %v5181_v55  ;;  %v1558_v2 = vcombine.low %v5186_v63, %v5189_v0 }
 0x368   : > { %v1122_v22 = vrot.slane %v1114_v13, %v5167_v26  ;;  %v1129_v23 = vrot.slane %v1115_v14, %v5167_v26  ;;  %v1138_v24 = vrot.slane %v1130_v15, %v5167_v26  ;;  %v1145_v9 = vrot.slane %v1131_v16, %v5167_v26  ;;  %v1067_v25 = vpop.permute.xlu1 %1066 }
 0x369   : > { %v1474_v27 = vcombine.low %v1450_v20, %v1466_v7  ;;  %v1475_v28 = vcombine.high %v1450_v20, %v1466_v7  ;;  %v1490_v29 = vcombine.low %v1457_v21, %v1473_v8  ;;  %v1491_v30 = vcombine.high %v1457_v21, %v1473_v8 }
 0x36a   : > { %v1218_v31 = vcombine.low %v1122_v22, %v1129_v23  ;;  %v3905_v33 = vcombine.high %v1122_v22, %v1129_v23  ;;  %v1234_v10 = vcombine.low %v1138_v24, %v1145_v9  ;;  %v3906_v34 = vcombine.high %v1138_v24, %v1145_v9 }
 0x36b   : > { %v1482_v35 = vrot.slane %v1474_v27, %v5167_v26  ;;  %v1489_v36 = vrot.slane %v1475_v28, %v5167_v26  ;;  %v1498_v37 = vrot.slane %v1490_v29, %v5167_v26  ;;  %v1505_v38 = vrot.slane %v1491_v30, %v5167_v26 }
 0x36c   : > { %v5210_v39 = vrot.slane %v1218_v31, %v5164_v19  ;;  %v5213_v40 = vrot.slane %v3905_v33, %v5164_v19  ;;  %v5216_v41 = vrot.slane %v1234_v10, %v5164_v19  ;;  %v5219_v42 = vrot.slane %v3906_v34, %v5164_v19  ;;  %v1079_v47 = vpop.permute.xlu1 %1078 }
 0x36d   : > { %v1578_v43 = vcombine.low %v1482_v35, %v1489_v36  ;;  %v3911_v44 = vcombine.high %v1482_v35, %v1489_v36  ;;  %v1594_v45 = vcombine.low %v1498_v37, %v1505_v38  ;;  %v3912_v46 = vcombine.high %v1498_v37, %v1505_v38 }
 0x36e   : > { %v1250_v48 = vcombine.low %v5210_v39, %v5213_v40  ;;  %v1266_v49 = vcombine.low %v5216_v41, %v5219_v42  ;;  %v1166_v60 = vcombine.low %v1067_v25, %v1079_v47  ;;  %v1167_v61 = vcombine.high %v1067_v25, %v1079_v47 }
 0x36f   : > { %v1585_v50 = vrot.slane %v1578_v43, %v5164_v19  ;;  %v1593_v51 = vrot.slane %v3911_v44, %v5164_v19  ;;  %v5228_v52 = vrot.slane %v1594_v45, %v5164_v19  ;;  %v1609_v53 = vrot.slane %v3912_v46, %v5164_v19 }
 0x370   : > { %v1158_v3 = vrot.slane %v1150_v17, %v5164_v19  ;;  %v1165_v5 = vrot.slane %v1151_v18, %v5164_v19  ;;  %v1174_v11 = vrot.slane %v1166_v60, %v5164_v19  ;;  %v1181_v12 = vrot.slane %v1167_v61, %v5164_v19 }
 0x371   : > { %v1610_v7 = vcombine.low %v1585_v50, %v1593_v51  ;;  %v1626_v8 = vcombine.low %v5228_v52, %v1609_v53  ;;  %v1550_v13 = vrot.slane %v1542_v1, %v5167_v26  ;;  %v1566_v14 = vrot.slane %v1558_v2, %v5167_v26 }
 0x372   : > { %v1258_v15 = vrot.slane %v1250_v48, %v5167_v26  ;;  %v1274_v16 = vrot.slane %v1266_v49, %v5167_v26  ;;  %v1182_v18 = vcombine.low %v1158_v3, %v1174_v11  ;;  %v1183_v21 = vcombine.high %v1158_v3, %v1174_v11 }
 0x373   : > { %v5245_v20 = vrot.slane %v1610_v7, %v5167_v26  ;;  %v5248_v17 = vrot.slane %v1626_v8, %v5167_v26  ;;  %v1198_v22 = vcombine.low %v1165_v5, %v1181_v12  ;;  %v1199_v23 = vcombine.high %v1165_v5, %v1181_v12 }
 0x374   : > { %v1574_v24 = vcombine.low %v1550_v13, %v1566_v14  ;;  %v1190_v25 = vrot.slane %v1182_v18, %v5167_v26  ;;  %v1197_v27 = vrot.slane %v1183_v21, %v5167_v26  ;;  %v1282_v31 = vcombine.low %v1258_v15, %v1274_v16 }
 0x375   : > { %v1642_v9 = vcombine.low %v5245_v20, %v5248_v17  ;;  %v1206_v28 = vrot.slane %v1198_v22, %v5167_v26  ;;  %v1213_v29 = vrot.slane %v1199_v23, %v5167_v26  ;;  %v1575_v33 = vcombine.high %v1550_v13, %v1566_v14 }
 0x376   : > { %v1946_v30 = vpack.c.bf16 %v1574_v24, %v1574_v24  ;;  %v1286_v34 = vcombine.low %v1190_v25, %v1197_v27  ;;  %v3907_v35 = vcombine.high %v1190_v25, %v1197_v27  ;;  %v1543_v44 = vcombine.high %v5178_v54, %v5181_v55 }
 0x377   : > { %v1950_v10 = vpack.c.bf16 %v1642_v9, %v1642_v9  ;;  %v1302_v36 = vcombine.low %v1206_v28, %v1213_v29  ;;  %v3908_v37 = vcombine.high %v1206_v28, %v1213_v29  ;;  %v1559_v49 = vcombine.high %v5186_v63, %v5189_v0 }
 0x378   : > { %v1959_v38 = vsel %vm1954_vm1, %v1946_v30, 0  ;;  %v1293_v45 = vrot.slane %v1286_v34, %v5164_v19  ;;  %v1301_v46 = vrot.slane %v3907_v35, %v5164_v19  ;;  %v1611_v60 = vcombine.high %v1585_v50, %v1593_v51 }
 0x379   : > { %v2143_v43 = vsel %vm1954_vm1, %v1950_v10, 0  ;;  %v1309_v47 = vrot.slane %v1302_v36, %v5164_v19  ;;  %v1317_v48 = vrot.slane %v3908_v37, %v5164_v19  ;;  %4085 = vmatpush3.bf16.xpose.msra.mxu1 %v1959_v38  ;;  %v1938_v2 = vpack.c.bf16 %v1282_v31, %v1282_v31 }
 0x37a   : > { %4090 = vmatprep.subr.bf16.mxu1 %v4666_v6  ;;  %4109 = vmatpush3.bf16.xpose.msra.mxu0 %v2143_v43  ;;  %v1318_v61 = vcombine.low %v1293_v45, %v1301_v46  ;;  %v1947_v54 = vpack.c.bf16 %v1575_v33, %v1575_v33  ;;  %v1557_v55 = vrot.slane %v1543_v44, %v5167_v26 }
 0x37b   : > { %v1334_v1 = vcombine.low %v1309_v47, %v1317_v48  ;;  %4120 = vmatprep.subr.bf16.mxu0 %v4666_v6  ;;  %v1573_v3 = vrot.slane %v1559_v49, %v5167_v26  ;;  %v1625_v5 = vrot.slane %v1611_v60, %v5167_v26  ;;  %v1627_v7 = vcombine.high %v5228_v52, %v1609_v53 }
 0x37c   : > { %v1326_v8 = vrot.slane %v1318_v61, %v5167_v26  ;;  %v1319_v63 = vcombine.high %v1293_v45, %v1301_v46  ;;  %v1335_v0 = vcombine.high %v1309_v47, %v1317_v48  ;;  %v2005_v12 = vsel %vm1954_vm1, %v1947_v54, 0 }
 0x37d   : > { %v1342_v11 = vrot.slane %v1334_v1, %v5167_v26  ;;  %v1641_v50 = vrot.slane %v1627_v7, %v5167_v26  ;;  %v1576_v13 = vcombine.low %v1557_v55, %v1573_v3  ;;  %v1251_v18 = vcombine.high %v5210_v39, %v5213_v40 }
 0x37e   : > { %v1267_v52 = vcombine.high %v5216_v41, %v5219_v42  ;;  %v1283_v21 = vcombine.high %v1258_v15, %v1274_v16  ;;  %v1333_v23 = vrot.slane %v1319_v63, %v5167_v26  ;;  %v1349_v24 = vrot.slane %v1335_v0, %v5167_v26 }
 0x37f   : > { %v1350_v51 = vcombine.low %v1326_v8, %v1342_v11  ;;  %v1644_v14 = vcombine.low %v1625_v5, %v1641_v50  ;;  %v1948_v9 = vpack.c.bf16 %v1576_v13, %v1576_v13  ;;  %v1265_v41 = vrot.slane %v1251_v18, %v5167_v26 }
 0x380   : > { %4087 = vmatmul.mubr.msk.bf16.vlgmr.msra.gmra.mrb[4].mxu1 %vm1954_vm1, %v1938_v2  ;;  %v1939_v40 = vpack.c.bf16 %v1283_v21, %v1283_v21  ;;  %v1281_v42 = vrot.slane %v1267_v52, %v5167_v26  ;;  %v1352_v15 = vcombine.low %v1333_v23, %v1349_v24  ;;  %v1577_v25 = vcombine.high %v1557_v55, %v1573_v3 }
 0x381   : > { %4091 = vmatpush3.bf16.xpose.msra.mxu1 %v2005_v12  ;;  %4092 = vmatprep.mubr.msk.bf16.mxu1 %vm4668_vm0, %v4666_v6  ;;  %v1942_v53 = vpack.c.bf16 %v1350_v51, %v1350_v51  ;;  %v1952_v22 = vpack.c.bf16 %v1644_v14, %v1644_v14  ;;  %v2051_v16 = vsel %vm1954_vm1, %v1948_v9, 0  ;;  %v1643_v33 = vcombine.high %v5245_v20, %v5248_v17 }
 0x382   : > { %4096 = vmatprep.subr.bf16.mxu1 %v4666_v6  ;;  %v1284_v27 = vcombine.low %v1265_v41, %v1281_v42  ;;  %v1944_v28 = vpack.c.bf16 %v1352_v15, %v1352_v15  ;;  %v1949_v29 = vpack.c.bf16 %v1577_v25, %v1577_v25  ;;  %v1285_v10 = vcombine.high %v1265_v41, %v1281_v42 }
 0x383   : > { %4111 = vmatmul.mubr.msk.bf16.vlgmr.msra.gmra.mrb[4].mxu0 %vm1954_vm1, %v1942_v53  ;;  %v2235_v39 = vsel %vm1954_vm1, %v1952_v22, 0  ;;  %v1951_v34 = vpack.c.bf16 %v1643_v33, %v1643_v33  ;;  %v1645_v37 = vcombine.high %v1625_v5, %v1641_v50  ;;  %v1351_v38 = vcombine.high %v1326_v8, %v1342_v11 }
 0x384   : > { %4122 = vmatprep.mubr.msk.bf16.mxu0 %vm4668_vm0, %v4666_v6  ;;  %4121 = vmatpush3.bf16.xpose.msra.mxu0 %v2235_v39  ;;  %v1940_v30 = vpack.c.bf16 %v1284_v27, %v1284_v27  ;;  %v2097_v31 = vsel %vm1954_vm1, %v1949_v29, 0  ;;  %v1941_v35 = vpack.c.bf16 %v1285_v10, %v1285_v10  ;;  %v1353_v44 = vcombine.high %v1333_v23, %v1349_v24 }
 0x385   : > { %4132 = vmatprep.subr.bf16.mxu0 %v4666_v6  ;;  %v2189_v36 = vsel %vm1954_vm1, %v1951_v34, 0  ;;  %v1953_v20 = vpack.c.bf16 %v1645_v37, %v1645_v37  ;;  %v1943_v17 = vpack.c.bf16 %v1351_v38, %v1351_v38  ;;  %v845_v14 = vsub.s32 2, %v5124_v56 }
 0x386   : > { %v1945_v45 = vpack.c.bf16 %v1353_v44, %v1353_v44 }
 0x387   : > { %v2281_v43 = vsel %vm1954_vm1, %v1953_v20, 0  ;;  %v846_v22 = vrot.slane %v5128_v58, %v845_v14 }
 0x388   : > { %4093 = vmatmul.mubr.msk.bf16.vlgmr.msra.gmra.mrb[8].mxu1 %vm1954_vm1, %v1939_v40 }
 0x389   : > { %4097 = vmatpush3.bf16.xpose.msra.mxu1 %v2051_v16  ;;  %4098 = vmatprep.mubr.msk.bf16.mxu1 %vm4668_vm0, %v4666_v6  ;;  %v5332_v24 = vadd.f32 %v5134_v62, %v846_v22 }
 0x38a   : > { %4102 = vmatprep.subr.bf16.mxu1 %v4666_v6 }
 0x38b   : > { %4123 = vmatmul.mubr.msk.bf16.vlgmr.msra.gmra.mrb[8].mxu0 %vm1954_vm1, %v1944_v28 }
 0x38c   : > { %4134 = vmatprep.mubr.msk.bf16.mxu0 %vm4668_vm0, %v4666_v6 }
 0x390   : > { %4099 = vmatmul.mubr.msk.bf16.vlgmr.msra.gmra.mrb[12].mxu1 %vm1954_vm1, %v1940_v30 }
 0x391   : > { %4103 = vmatpush3.bf16.xpose.msra.mxu1 %v2097_v31  ;;  %4104 = vmatprep.mubr.msk.bf16.mxu1 %vm4668_vm0, %v4666_v6  ;;  %v5350_v31 = vadd.f32 %v5139_v4, %v846_v22 }
 0x392   : > { %4114 = vmatprep.subr.bf16.mxu1 %v4666_v6 }
 0x398   : > { %4105 = vmatmul.mubr.msk.bf16.vlgmr.msra.gmra.mrb[16].mxu1 %vm1954_vm1, %v1941_v35 }
 0x399   : > { %4115 = vmatpush3.bf16.xpose.msra.mxu1 %v2189_v36  ;;  %4116 = vmatprep.mubr.msk.bf16.mxu1 %vm4668_vm0, %v4666_v6 }
 0x39a   : > { %4126 = vmatprep.subr.bf16.mxu1 %v4666_v6 }
 0x3a0   : > { %4117 = vmatmul.mubr.msk.bf16.vlgmr.msra.gmra.mrb[20].mxu1 %vm1954_vm1, %v1943_v17 }
 0x3a1   : > { %4127 = vmatpush3.bf16.xpose.msra.mxu1 %v2281_v43  ;;  %4128 = vmatprep.mubr.msk.bf16.mxu1 %vm4668_vm0, %v4666_v6 }
 0x3a2   : > { %4138 = vmatprep.subr.bf16.mxu1 %v4666_v6 }
 0x3a8   : > { %4129 = vmatmul.mubr.msk.bf16.vlgmr.msra.gmra.mrb[24].mxu1 %vm1954_vm1, %v1945_v45 }
 0x3a9   : > { %4140 = vmatprep.mubr.msk.bf16.mxu1 %vm4668_vm0, %v4666_v6 }
 0x453   : > { %v1995_v46 = vpop.f32.mrb[4].mxu1 }
 0x454   : > { %v4088_v47 = vpop.f32.mrb[5].mxu1  ;;  %v2324_v48 = vsel %vm2323_vm2, %v1995_v46, -inf }
 0x455   : > { %2325 = vmax.xlane.f32.xlu0 %v2324_v48  ;;  %v1998_v49 = vpop.f32.mrb[6].mxu1 }
 0x456   : > { %v4089_v60 = vpop.f32.mrb[7].mxu1  ;;  %v2179_v61 = vpop.f32.mrb[4].mxu0 }
 0x457   : > { %v4112_v1 = vpop.f32.mrb[5].mxu0  ;;  %v2336_v2 = vsel %vm2323_vm2, %v2179_v61, -inf }
 0x458   : > { %v2182_v54 = vpop.f32.mrb[6].mxu0 }
 0x459   : > { %2337 = vmax.xlane.f32.xlu0 %v2336_v2  ;;  %v4113_v55 = vpop.f32.mrb[7].mxu0 }
 0x45b   : > { %v2041_v3 = vpop.f32.mrb[8].mxu1 }
 0x45c   : > { %v4094_v5 = vpop.f32.mrb[9].mxu1  ;;  %v2327_v7 = vsel %vm2323_vm2, %v2041_v3, -inf }
 0x45d   : > { %2328 = vmax.xlane.f32.xlu1 %v2327_v7  ;;  %v2044_v8 = vpop.f32.mrb[10].mxu1 }
 0x45e   : > { %v4095_v11 = vpop.f32.mrb[11].mxu1  ;;  %v5324_v63 = vpop.f32.mrb[8].mxu0 }
 0x45f   : > { %v4124_v0 = vpop.f32.mrb[9].mxu0  ;;  %v2342_v50 = vsel %vm2323_vm2, %v5324_v63, -inf }
 0x460   : > { %2343 = vmax.xlane.f32.xlu0 %v2342_v50  ;;  %v2274_v51 = vpop.f32.mrb[10].mxu0 }
 0x461   : > { %v4125_v12 = vpop.f32.mrb[11].mxu0 }
 0x463   : > { %v2087_v13 = vpop.f32.mrb[12].mxu1 }
 0x464   : > { %v4100_v18 = vpop.f32.mrb[13].mxu1  ;;  %v2330_v52 = vsel %vm2323_vm2, %v2087_v13, -inf }
 0x465   : > { %v2090_v53 = vpop.f32.mrb[14].mxu1  ;;  %2331 = vmax.xlane.f32.xlu0 %v2330_v52 }
 0x466   : > { %v4101_v21 = vpop.f32.mrb[15].mxu1 }
 0x46b   : > { %v2133_v23 = vpop.f32.mrb[16].mxu1 }
 0x46c   : > { %v4106_v9 = vpop.f32.mrb[17].mxu1  ;;  %v2333_v39 = vsel %vm2323_vm2, %v2133_v23, -inf }
 0x46d   : > { %v2136_v40 = vpop.f32.mrb[18].mxu1  ;;  %2334 = vmax.xlane.f32.xlu0 %v2333_v39 }
 0x46e   : > { %1654 = vrot.lane.b32.xlu1 %v5332_v24, %s4669_s15  ;;  %v4107_v41 = vpop.f32.mrb[19].mxu1 }
 0x472   : > { %1660 = vrot.lane.b32.xlu1 %v5332_v24, %s4671_s9 }
 0x473   : > { %v5339_v42 = vpop.f32.mrb[20].mxu1 }
 0x474   : > { %v4118_v15 = vpop.f32.mrb[21].mxu1  ;;  %v2339_v29 = vsel %vm2323_vm2, %v5339_v42, -inf }
 0x475   : > { %v2228_v58 = vpop.f32.mrb[22].mxu1 }
 0x476   : > { %v4119_v16 = vpop.f32.mrb[23].mxu1 }
 0x47b   : > { %v5341_v25 = vpop.f32.mrb[24].mxu1 }
 0x47c   : > { %v4130_v62 = vpop.f32.mrb[25].mxu1  ;;  %v2345_v30 = vsel %vm2323_vm2, %v5341_v25, -inf }
 0x47d   : > { %v2320_v27 = vpop.f32.mrb[26].mxu1 }
 0x47e   : > { %v4131_v28 = vpop.f32.mrb[27].mxu1 }
 0x483   : > { %1648 = vrot.lane.b32.xlu0 %v5332_v24, %s4670_s29 }
 0x496   : > { %2340 = vmax.xlane.f32.xlu1 %v2339_v29 }
 0x49a   : > { %2346 = vmax.xlane.f32.xlu1 %v2345_v30 }
 0x4ab   : > { %1650 = vrot.lane.b32.xlu1 %v5350_v31, %s4670_s29 }
 0x4e2   : > { %v2326_v33 = vpop.xlane.xlu0 %2325 }
 0x4e3   : > { %v2348_v10 = vsub.f32 %v1995_v46, %v2326_v33 }
 0x4e5   : > { %v2356_v34 = vmul.f32 1.442695, %v2348_v10 }
 0x4e6   : > { %v2338_v35 = vpop.xlane.xlu0 %2337 }
 0x4e7   : > { %4391 = vpow2.f32 %v2356_v34  ;;  %v2352_v36 = vsub.f32 %v2179_v61, %v2338_v35 }
 0x4e9   : > { %v2364_v37 = vmul.f32 1.442695, %v2352_v36 }
 0x4ea   : > { %v2329_v38 = vpop.xlane.xlu1 %2328 }
 0x4eb   : > { %v2349_v20 = vsub.f32 %v2041_v3, %v2329_v38  ;;  %4393 = vpow2.f32 %v2364_v37 }
 0x4ed   : > { %v2358_v17 = vmul.f32 1.442695, %v2349_v20  ;;  %v5354_v43 = vpop.xlane.xlu0 %2343 }
 0x4ee   : > { %v1655_v60 = vpop.permute.xlu1 %1654 }
 0x4ef   : > { %4395 = vpow2.f32 %v2358_v17  ;;  %v1666_v55 = vcombine.low %v5332_v24, %v1655_v60  ;;  %v1667_v3 = vcombine.high %v5332_v24, %v1655_v60 }
 0x4f1   : > { %v5356_v44 = vpop.eup %4391  ;;  %v1674_v51 = vrot.slane %v1666_v55, %v5164_v19  ;;  %v1681_v12 = vrot.slane %v1667_v3, %v5164_v19 }
 0x4f2   : > { %v2372_v4 = vsel %vm2323_vm2, %v5356_v44, 0.0  ;;  %v2332_v45 = vpop.xlane.xlu0 %2331  ;;  %v1661_v7 = vpop.permute.xlu1 %1660 }
 0x4f3   : > { %2373 = vadd.xlane.f32.xlu0 %v2372_v4  ;;  %v2350_v46 = vsub.f32 %v2087_v13, %v2332_v45 }
 0x4f5   : > { %v5360_v47 = vpop.eup %4393  ;;  %v2360_v48 = vmul.f32 1.442695, %v2350_v46 }
 0x4f6   : > { %v2384_v49 = vsel %vm2323_vm2, %v5360_v47, 0.0 }
 0x4f7   : > { %4397 = vpow2.f32 %v2360_v48  ;;  %2385 = vadd.xlane.f32.xlu0 %v2384_v49 }
 0x4f9   : > { %v5364_v61 = vpop.eup %4395 }
 0x4fa   : > { %v2375_v1 = vsel %vm2323_vm2, %v5364_v61, 0.0  ;;  %v2335_v2 = vpop.xlane.xlu0 %2334 }
 0x4fb   : > { %2376 = vadd.xlane.f32.xlu1 %v2375_v1  ;;  %v2351_v54 = vsub.f32 %v2133_v23, %v2335_v2  ;;  %v2354_v2 = vsub.f32 %v5324_v63, %v5354_v43 }
 0x4fd   : > { %v2362_v5 = vmul.f32 1.442695, %v2351_v54 }
 0x4fe   : > { %v1649_v8 = vpop.permute.xlu0 %1648 }
 0x4ff   : > { %4399 = vpow2.f32 %v2362_v5  ;;  %v1682_v11 = vcombine.low %v1649_v8, %v1661_v7  ;;  %v1683_v0 = vcombine.high %v1649_v8, %v1661_v7  ;;  %v2368_v5 = vmul.f32 1.442695, %v2354_v2 }
 0x501   : > { %v5370_v50 = vpop.eup %4397  ;;  %v1690_v13 = vrot.slane %v1682_v11, %v5164_v19  ;;  %v1697_v14 = vrot.slane %v1683_v0, %v5164_v19 }
 0x502   : > { %v2378_v18 = vsel %vm2323_vm2, %v5370_v50, 0.0 }
 0x503   : > { %v1698_v52 = vcombine.low %v1674_v51, %v1690_v13  ;;  %v1699_v53 = vcombine.high %v1674_v51, %v1690_v13  ;;  %v1714_v21 = vcombine.low %v1681_v12, %v1697_v14  ;;  %v1715_v22 = vcombine.high %v1681_v12, %v1697_v14  ;;  %2379 = vadd.xlane.f32.xlu1 %v2378_v18 }
 0x505   : > { %v1706_v23 = vrot.slane %v1698_v52, %v5167_v26  ;;  %v1713_v24 = vrot.slane %v1699_v53, %v5167_v26  ;;  %v1722_v9 = vrot.slane %v1714_v21, %v5167_v26  ;;  %v1729_v39 = vrot.slane %v1715_v22, %v5167_v26 }
 0x507   : > { %v1802_v40 = vcombine.low %v1706_v23, %v1713_v24  ;;  %v3913_v41 = vcombine.high %v1706_v23, %v1713_v24  ;;  %v1818_v15 = vcombine.low %v1722_v9, %v1729_v39  ;;  %v3914_v58 = vcombine.high %v1722_v9, %v1729_v39 }
 0x509   : > { %v5382_v16 = vpop.eup %4399  ;;  %v1809_v62 = vrot.slane %v1802_v40, %v5164_v19  ;;  %v1817_v27 = vrot.slane %v3913_v41, %v5164_v19  ;;  %v1825_v28 = vrot.slane %v1818_v15, %v5164_v19  ;;  %v1833_v29 = vrot.slane %v3914_v58, %v5164_v19 }
 0x50a   : > { %v2381_v30 = vsel %vm2323_vm2, %v5382_v16, 0.0 }
 0x50b   : > { %2382 = vadd.xlane.f32.xlu0 %v2381_v30  ;;  %v1834_v33 = vcombine.low %v1809_v62, %v1817_v27  ;;  %v1850_v10 = vcombine.low %v1825_v28, %v1833_v29  ;;  %v1835_v34 = vcombine.high %v1809_v62, %v1817_v27  ;;  %v1851_v35 = vcombine.high %v1825_v28, %v1833_v29 }
 0x50d   : > { %v1842_v36 = vrot.slane %v1834_v33, %v5167_v26  ;;  %v1858_v37 = vrot.slane %v1850_v10, %v5167_v26  ;;  %v1849_v38 = vrot.slane %v1835_v34, %v5167_v26  ;;  %v1865_v20 = vrot.slane %v1851_v35, %v5167_v26 }
 0x50f   : > { %v1866_v17 = vcombine.low %v1842_v36, %v1858_v37  ;;  %v1867_v4 = vcombine.high %v1842_v36, %v1858_v37  ;;  %v1868_v45 = vcombine.low %v1849_v38, %v1865_v20  ;;  %v1869_v46 = vcombine.high %v1849_v38, %v1865_v20 }
 0x511   : > { %v2420_v48 = vpack.c.bf16 %v1866_v17, %v1866_v17  ;;  %v2421_v49 = vpack.c.bf16 %v1867_v4, %v1867_v4  ;;  %v2422_v21 = vpack.c.bf16 %v1868_v45, %v1868_v45  ;;  %v2423_v40 = vpack.c.bf16 %v1869_v46, %v1869_v46 }
 0x513   : > { %v2433_v60 = vsel %vm2431_vm3, %v2420_v48, 0  ;;  %v2479_v1 = vsel %vm2431_vm3, %v2421_v49, 0  ;;  %v2571_v41 = vsel %vm2431_vm3, %v2423_v40, 0 }
 0x514   : > { %4133 = vmatpush3.bf16.msra.mxu0 %v2433_v60  ;;  %4139 = vmatpush3.bf16.msra.mxu1 %v2479_v1 }
 0x515   : > { %1662 = vrot.lane.b32.xlu1 %v5350_v31, %s4671_s9  ;;  %4144 = vmatprep.subr.bf16.mxu0 %v4666_v6 }
 0x516   : > { %4150 = vmatprep.subr.bf16.mxu1 %v4666_v6 }
 0x523   : > { %v2341_v54 = vpop.xlane.xlu1 %2340 }
 0x524   : > { %v2353_v55 = vsub.f32 %v5339_v42, %v2341_v54 }
 0x526   : > { %v2366_v3 = vmul.f32 1.442695, %v2353_v55 }
 0x527   : > { %v2347_v63 = vpop.xlane.xlu1 %2346 }
 0x528   : > { %4401 = vpow2.f32 %v2366_v3  ;;  %v2355_v42 = vsub.f32 %v5341_v25, %v2347_v63  ;;  %v2525_v25 = vsel %vm2431_vm3, %v2422_v21, 0 }
 0x529   : > { %4403 = vpow2.f32 %v2368_v5 }
 0x52a   : > { %v2370_v43 = vmul.f32 1.442695, %v2355_v42 }
 0x52b   : > { %v1651_v14 = vpop.permute.xlu1 %1650 }
 0x52c   : > { %4405 = vpow2.f32 %v2370_v43 }
 0x532   : > { %v5403_v7 = vpop.eup %4401 }
 0x533   : > { %v2387_v8 = vsel %vm2323_vm2, %v5403_v7, 0.0  ;;  %v5407_v11 = vpop.eup %4403 }
 0x534   : > { %2388 = vadd.xlane.f32.xlu0 %v2387_v8  ;;  %v2390_v0 = vsel %vm2323_vm2, %v5407_v11, 0.0 }
 0x536   : > { %v5414_v51 = vpop.eup %4405 }
 0x537   : > { %v2393_v12 = vsel %vm2323_vm2, %v5414_v51, 0.0 }
 0x539   : > { %2391 = vadd.xlane.f32.xlu1 %v2390_v0 }
 0x54a   : > { %1656 = vrot.lane.b32.xlu0 %v5350_v31, %s4669_s15 }
 0x569   : > { %2394 = vadd.xlane.f32.xlu0 %v2393_v12 }
 0x580   : > { %v2374_v13 = vpop.xlane.xlu0 %2373 }
 0x581   : > { %4407 = vrcp.f32 %v2374_v13 }
 0x584   : > { %v2386_v39 = vpop.xlane.xlu0 %2385 }
 0x588   : > { %v2377_v18 = vpop.xlane.xlu1 %2376 }
 0x589   : > { %4409 = vrcp.f32 %v2377_v18 }
 0x58b   : > { %v4408_v52 = vpop.eup %4407 }
 0x58c   : > { %v2404_v53 = vmul.f32 %v4408_v52, %v5356_v44 }
 0x58e   : > { %v2412_v22 = vpack.c.bf16 %v2404_v53, %v2404_v53 }
 0x590   : > { %4135 = vmatmul.mubr.msk.bf16.vlgmr.msra.gmra.mrb[12].mxu0 %vm2323_vm2, %v2412_v22  ;;  %v2380_v23 = vpop.xlane.xlu1 %2379 }
 0x591   : > { %4145 = vmatpush3.bf16.msra.mxu0 %v2525_v25  ;;  %4411 = vrcp.f32 %v2380_v23  ;;  %4146 = vmatprep.mubr.msk.bf16.mxu0 %vm4668_vm0, %v4666_v6 }
 0x592   : > { %4156 = vmatprep.subr.bf16.mxu0 %v4666_v6 }
 0x593   : > { %v4410_v24 = vpop.eup %4409 }
 0x594   : > { %v2405_v9 = vmul.f32 %v4410_v24, %v5364_v61  ;;  %v1663_v30 = vpop.permute.xlu1 %1662 }
 0x595   : > { %v1750_v10 = vcombine.low %v1651_v14, %v1663_v30  ;;  %v1751_v34 = vcombine.high %v1651_v14, %v1663_v30 }
 0x596   : > { %v2413_v44 = vpack.c.bf16 %v2405_v9, %v2405_v9 }
 0x597   : > { %v1758_v37 = vrot.slane %v1750_v10, %v5164_v19  ;;  %v1765_v38 = vrot.slane %v1751_v34, %v5164_v19 }
 0x598   : > { %4141 = vmatmul.mubr.msk.bf16.vlgmr.msra.gmra.mrb[28].mxu1 %vm2323_vm2, %v2413_v44  ;;  %v2383_v15 = vpop.xlane.xlu0 %2382 }
 0x599   : > { %4151 = vmatpush3.bf16.msra.mxu1 %v2571_v41  ;;  %4413 = vrcp.f32 %v2383_v15  ;;  %4152 = vmatprep.mubr.msk.bf16.mxu1 %vm4668_vm0, %v4666_v6 }
 0x59a   : > { %4162 = vmatprep.subr.bf16.mxu1 %v4666_v6  ;;  %4415 = vrcp.f32 %v2386_v39 }
 0x59b   : > { %v4412_v58 = vpop.eup %4411 }
 0x59c   : > { %v2406_v62 = vmul.f32 %v4412_v58, %v5370_v50 }
 0x59e   : > { %v2414_v27 = vpack.c.bf16 %v2406_v62, %v2406_v62 }
 0x5a0   : > { %4147 = vmatmul.mubr.msk.bf16.vlgmr.msra.gmra.mrb[16].mxu0 %vm2323_vm2, %v2414_v27 }
 0x5a1   : > { %4158 = vmatprep.mubr.msk.bf16.mxu0 %vm4668_vm0, %v4666_v6 }
 0x5a3   : > { %v4414_v61 = vpop.eup %4413 }
 0x5a4   : > { %v2407_v28 = vmul.f32 %v4414_v61, %v5382_v16  ;;  %v4416_v13 = vpop.eup %4415 }
 0x5a5   : > { %v2408_v39 = vmul.f32 %v4416_v13, %v5360_v47 }
 0x5a6   : > { %v2415_v29 = vpack.c.bf16 %v2407_v28, %v2407_v28 }
 0x5a7   : > { %v2416_v61 = vpack.c.bf16 %v2408_v39, %v2408_v39 }
 0x5a8   : > { %4153 = vmatmul.mubr.msk.bf16.vlgmr.msra.gmra.mrb[32].mxu1 %vm2323_vm2, %v2415_v29 }
 0x5a9   : > { %4164 = vmatprep.mubr.msk.bf16.mxu1 %vm4668_vm0, %v4666_v6 }
 0x5c1   : > { %v2389_v33 = vpop.xlane.xlu0 %2388 }
 0x5c2   : > { %4417 = vrcp.f32 %v2389_v33 }
 0x5c5   : > { %v1657_v50 = vpop.permute.xlu0 %1656 }
 0x5c6   : > { %v1734_v35 = vcombine.low %v5350_v31, %v1657_v50  ;;  %v1735_v36 = vcombine.high %v5350_v31, %v1657_v50  ;;  %v2392_v63 = vpop.xlane.xlu1 %2391 }
 0x5c7   : > { %4419 = vrcp.f32 %v2392_v63 }
 0x5c8   : > { %v1742_v16 = vrot.slane %v1734_v35, %v5164_v19  ;;  %v1749_v20 = vrot.slane %v1735_v36, %v5164_v19 }
 0x5ca   : > { %v1766_v17 = vcombine.low %v1742_v16, %v1758_v37  ;;  %v1767_v4 = vcombine.high %v1742_v16, %v1758_v37  ;;  %v1782_v45 = vcombine.low %v1749_v20, %v1765_v38  ;;  %v1783_v46 = vcombine.high %v1749_v20, %v1765_v38 }
 0x5cc   : > { %v1774_v48 = vrot.slane %v1766_v17, %v5167_v26  ;;  %v1781_v49 = vrot.slane %v1767_v4, %v5167_v26  ;;  %v1790_v31 = vrot.slane %v1782_v45, %v5167_v26  ;;  %v1797_v60 = vrot.slane %v1783_v46, %v5167_v26  ;;  %v4418_v21 = vpop.eup %4417  ;;  %v4339_v45 = vld [vmem:[%s5011_s24] sm:$0xff]  }
 0x5cd   : > { %v2409_v40 = vmul.f32 %v4418_v21, %v5403_v7 }
 0x5ce   : > { %v1870_v1 = vcombine.low %v1774_v48, %v1781_v49  ;;  %v3915_v2 = vcombine.high %v1774_v48, %v1781_v49  ;;  %v1886_v54 = vcombine.low %v1790_v31, %v1797_v60  ;;  %v3916_v55 = vcombine.high %v1790_v31, %v1797_v60  ;;  %v4340_v31 = vld [vmem:[%s5011_s24 + $0x8] sm:$0xff]  }
 0x5cf   : > { %v2417_v28 = vpack.c.bf16 %v2409_v40, %v2409_v40 }
 0x5d0   : > { %v1877_v3 = vrot.slane %v1870_v1, %v5164_v19  ;;  %v1885_v5 = vrot.slane %v3915_v2, %v5164_v19  ;;  %v1893_v8 = vrot.slane %v1886_v54, %v5164_v19  ;;  %v1901_v0 = vrot.slane %v3916_v55, %v5164_v19  ;;  %v4341_v1 = vld [vmem:[%s5011_s24 + $0x10] sm:$0xff]  }
 0x5d1   : > { %v4420_v29 = vpop.eup %4419 }
 0x5d2   : > { %v1902_v42 = vcombine.low %v1877_v3, %v1885_v5  ;;  %v1918_v43 = vcombine.low %v1893_v8, %v1901_v0  ;;  %v1903_v12 = vcombine.high %v1877_v3, %v1885_v5  ;;  %v1919_v14 = vcombine.high %v1893_v8, %v1901_v0  ;;  %v4342_v5 = vld [vmem:[%s5011_s24 + $0x18] sm:$0xff]  }
 0x5d3   : > { %v2410_v30 = vmul.f32 %v4420_v29, %v5407_v11 }
 0x5d4   : > { %v1910_v18 = vrot.slane %v1902_v42, %v5167_v26  ;;  %v1926_v52 = vrot.slane %v1918_v43, %v5167_v26  ;;  %v1917_v53 = vrot.slane %v1903_v12, %v5167_v26  ;;  %v1933_v22 = vrot.slane %v1919_v14, %v5167_v26 }
 0x5d5   : > { %v2418_v33 = vpack.c.bf16 %v2410_v30, %v2410_v30 }
 0x5d6   : > { %v1934_v25 = vcombine.low %v1910_v18, %v1926_v52  ;;  %v1935_v23 = vcombine.high %v1910_v18, %v1926_v52  ;;  %v1936_v24 = vcombine.low %v1917_v53, %v1933_v22  ;;  %v1937_v9 = vcombine.high %v1917_v53, %v1933_v22  ;;  %v4343_v53 = vld [vmem:[%s5011_s24 + $0x20] sm:$0xff]  }
 0x5d8   : > { %v2424_v44 = vpack.c.bf16 %v1934_v25, %v1934_v25  ;;  %v2425_v41 = vpack.c.bf16 %v1935_v23, %v1935_v23  ;;  %v2426_v62 = vpack.c.bf16 %v1936_v24, %v1936_v24  ;;  %v2427_v27 = vpack.c.bf16 %v1937_v9, %v1937_v9 }
 0x5da   : > { %v2617_v15 = vsel %vm2431_vm3, %v2424_v44, 0  ;;  %v2663_v58 = vsel %vm2431_vm3, %v2425_v41, 0  ;;  %v2709_v47 = vsel %vm2431_vm3, %v2426_v62, 0  ;;  %v2755_v7 = vsel %vm2431_vm3, %v2427_v27, 0  ;;  %v4344_v44 = vld [vmem:[%s5011_s24 + $0x28] sm:$0xff]  }
 0x5db   : > { %4157 = vmatpush3.bf16.msra.mxu0 %v2617_v15  ;;  %4163 = vmatpush3.bf16.msra.mxu1 %v2663_v58 }
 0x5dc   : > { %4168 = vmatprep.subr.bf16.mxu0 %v4666_v6  ;;  %4174 = vmatprep.subr.bf16.mxu1 %v4666_v6 }
 0x5de   : > { %4159 = vmatmul.mubr.msk.bf16.vlgmr.msra.gmra.mrb[20].mxu0 %vm2323_vm2, %v2416_v61  ;;  %4165 = vmatmul.mubr.msk.bf16.vlgmr.msra.gmra.mrb[36].mxu1 %vm2323_vm2, %v2417_v28 }
 0x5df   : > { %4169 = vmatpush3.bf16.msra.mxu0 %v2709_v47  ;;  %4175 = vmatpush3.bf16.msra.mxu1 %v2755_v7 }
 0x5e0   : > { %4170 = vmatprep.mubr.msk.bf16.mxu0 %vm4668_vm0, %v4666_v6  ;;  %4176 = vmatprep.mubr.msk.bf16.mxu1 %vm4668_vm0, %v4666_v6 }
 0x5e1   : > { %4180 = vmatprep.subr.bf16.mxu0 %v4666_v6 }
 0x5e6   : > { %4171 = vmatmul.mubr.msk.bf16.vlgmr.msra.gmra.mrb[24].mxu0 %vm2323_vm2, %v2418_v33 }
 0x5e7   : > { %4196 = vmatprep.mubr.msk.bf16.mxu0 %vm4668_vm0, %v4666_v6  ;;  %4181 = vmatpush3.bf16.msra.mxu0 %v4339_v45 }
 0x5e8   : > { %4182 = vmatprep.subr.bf16.mxu0 %v4666_v6 }
 0x5eb   : > { %4183 = vmatpush3.bf16.msra.mxu0 %v4340_v31 }
 0x5ec   : > { %4184 = vmatprep.subr.bf16.mxu0 %v4666_v6 }
 0x5ef   : > { %4185 = vmatpush3.bf16.msra.mxu0 %v4341_v1 }
 0x5f0   : > { %4186 = vmatprep.subr.bf16.mxu0 %v4666_v6 }
 0x5f3   : > { %4187 = vmatpush3.bf16.msra.mxu0 %v4342_v5 }
 0x5f4   : > { %4188 = vmatprep.subr.bf16.mxu0 %v4666_v6 }
 0x5f6   : > { %v2395_v10 = vpop.xlane.xlu0 %2394 }
 0x5f7   : > { %4421 = vrcp.f32 %v2395_v10  ;;  %4189 = vmatpush3.bf16.msra.mxu0 %v4343_v53 }
 0x5f8   : > { %4190 = vmatprep.subr.bf16.mxu0 %v4666_v6 }
 0x5fb   : > { %4191 = vmatpush3.bf16.msra.mxu0 %v4344_v44 }
 0x5fc   : > { %4192 = vmatprep.subr.bf16.mxu0 %v4666_v6 }
 0x601   : > { %v4422_v34 = vpop.eup %4421 }
 0x602   : > { %v2411_v11 = vmul.f32 %v4422_v34, %v5414_v51 }
 0x604   : > { %v2419_v50 = vpack.c.bf16 %v2411_v11, %v2411_v11 }
 0x606   : > { %4177 = vmatmul.mubr.msk.bf16.vlgmr.msra.gmra.mrb[40].mxu1 %vm2323_vm2, %v2419_v50 }
 0x607   : > { %3397 = vmatprep.mubr.bf16.mxu1 %v4667_v32 }
 0x663   : > { %v2469_v35 = vpop.f32.mrb[12].mxu0 }
 0x664   : > { %v4136_v36 = vpop.f32.mrb[13].mxu0 }
 0x665   : > { %v2472_v37 = vpop.f32.mrb[14].mxu0 }
 0x666   : > { %v4137_v38 = vpop.f32.mrb[15].mxu0 }
 0x66b   : > { %v2515_v16 = vpop.f32.mrb[28].mxu1 }
 0x66c   : > { %v4142_v20 = vpop.f32.mrb[29].mxu1 }
 0x66d   : > { %v2518_v17 = vpop.f32.mrb[30].mxu1 }
 0x66e   : > { %v4143_v4 = vpop.f32.mrb[31].mxu1 }
 0x673   : > { %v2561_v46 = vpop.f32.mrb[16].mxu0 }
 0x674   : > { %v2797_v48 = vcombine.low %v2469_v35, %v2561_v46  ;;  %v2798_v51 = vcombine.high %v2469_v35, %v2561_v46  ;;  %v4148_v49 = vpop.f32.mrb[17].mxu0 }
 0x675   : > { %v2564_v60 = vpop.f32.mrb[18].mxu0 }
 0x676   : > { %v4149_v32 = vpop.f32.mrb[19].mxu0  ;;  %v2805_v0 = vrot.slane %v2797_v48, %v5164_v19  ;;  %v2812_v63 = vrot.slane %v2798_v51, %v5164_v19 }
 0x67b   : > { %v2607_v2 = vpop.f32.mrb[32].mxu1 }
 0x67c   : > { %v2813_v54 = vcombine.low %v2515_v16, %v2607_v2  ;;  %v2814_v55 = vcombine.high %v2515_v16, %v2607_v2  ;;  %v4154_v3 = vpop.f32.mrb[33].mxu1 }
 0x67d   : > { %v2610_v8 = vpop.f32.mrb[34].mxu1 }
 0x67e   : > { %v2821_v42 = vrot.slane %v2813_v54, %v5164_v19  ;;  %v2828_v43 = vrot.slane %v2814_v55, %v5164_v19  ;;  %v4155_v12 = vpop.f32.mrb[35].mxu1 }
 0x680   : > { %v2829_v13 = vcombine.low %v2805_v0, %v2821_v42  ;;  %v2830_v14 = vcombine.high %v2805_v0, %v2821_v42  ;;  %v2845_v18 = vcombine.low %v2812_v63, %v2828_v43  ;;  %v2846_v52 = vcombine.high %v2812_v63, %v2828_v43 }
 0x682   : > { %v2837_v21 = vrot.slane %v2829_v13, %v5167_v26  ;;  %v2844_v22 = vrot.slane %v2830_v14, %v5167_v26  ;;  %v2853_v25 = vrot.slane %v2845_v18, %v5167_v26  ;;  %v2860_v23 = vrot.slane %v2846_v52, %v5167_v26 }
 0x684   : > { %v2933_v24 = vcombine.low %v2837_v21, %v2844_v22  ;;  %v3933_v9 = vcombine.high %v2837_v21, %v2844_v22  ;;  %v2949_v39 = vcombine.low %v2853_v25, %v2860_v23  ;;  %v3934_v40 = vcombine.high %v2853_v25, %v2860_v23  ;;  %v4345_v23 = vld [vmem:[%s5011_s24 + $0x30] sm:$0xff]  }
 0x685   : > { %4193 = vmatpush3.bf16.msra.mxu0 %v4345_v23  ;;  %v4353_v23 = vld [vmem:[%s5013_s18 + $0x20] ss:$8 sps:$4 sm:$0xff]  }
 0x686   : > { %v2940_v41 = vrot.slane %v2933_v24, %v5164_v19  ;;  %v2948_v15 = vrot.slane %v3933_v9, %v5164_v19  ;;  %v2956_v58 = vrot.slane %v2949_v39, %v5164_v19  ;;  %v2964_v62 = vrot.slane %v3934_v40, %v5164_v19  ;;  %4194 = vmatprep.subr.bf16.mxu0 %v4666_v6 }
 0x688   : > { %v2966_v27 = vcombine.high %v2940_v41, %v2948_v15  ;;  %v2982_v61 = vcombine.high %v2956_v58, %v2964_v62  ;;  %v2965_v28 = vcombine.low %v2940_v41, %v2948_v15  ;;  %v2981_v29 = vcombine.low %v2956_v58, %v2964_v62 }
 0x68a   : > { %v5503_v47 = vrot.slane %v2966_v27, %v5167_v26  ;;  %v5506_v7 = vrot.slane %v2982_v61, %v5167_v26  ;;  %v5509_v30 = vrot.slane %v2965_v28, %v5167_v26  ;;  %v5512_v33 = vrot.slane %v2981_v29, %v5167_v26  ;;  %v4346_v29 = vld [vmem:[%s5011_s24 + $0x38] sm:$0xff]  }
 0x68b   : > { %4195 = vmatpush3.bf16.msra.mxu0 %v4346_v29  ;;  %v4368_v29 = vld [vmem:[%s5013_s18 + $0x70] ss:$8 sps:$4 sm:$0xff]  }
 0x68c   : > { %v2999_v10 = vcombine.low %v5503_v47, %v5506_v7  ;;  %v2997_v34 = vcombine.low %v5509_v30, %v5512_v33  ;;  %v2998_v11 = vcombine.high %v5509_v30, %v5512_v33  ;;  %v3000_v50 = vcombine.high %v5503_v47, %v5506_v7  ;;  %v3937_v30 = vld [vmem:[%s5736_s12] ss:$0 sm:$0xff] }
 0x6b1   : > { %v2653_v35 = vpop.f32.mrb[20].mxu0  ;;  %v2699_v36 = vpop.f32.mrb[36].mxu1 }
 0x6b2   : > { %v4160_v37 = vpop.f32.mrb[21].mxu0  ;;  %v4166_v38 = vpop.f32.mrb[37].mxu1 }
 0x6b3   : > { %v2656_v16 = vpop.f32.mrb[22].mxu0  ;;  %v2702_v20 = vpop.f32.mrb[38].mxu1 }
 0x6b4   : > { %v4161_v17 = vpop.f32.mrb[23].mxu0  ;;  %v4167_v4 = vpop.f32.mrb[39].mxu1 }
 0x6b9   : > { %v2745_v45 = vpop.f32.mrb[24].mxu0 }
 0x6ba   : > { %v2865_v46 = vcombine.low %v2653_v35, %v2745_v45  ;;  %v2866_v48 = vcombine.high %v2653_v35, %v2745_v45  ;;  %v4172_v51 = vpop.f32.mrb[25].mxu0 }
 0x6bb   : > { %v2748_v49 = vpop.f32.mrb[26].mxu0 }
 0x6bc   : > { %v4173_v31 = vpop.f32.mrb[27].mxu0  ;;  %v2873_v55 = vrot.slane %v2865_v46, %v5164_v19  ;;  %v2880_v3 = vrot.slane %v2866_v48, %v5164_v19 }
 0x6d9   : > { %v2791_v60 = vpop.f32.mrb[40].mxu1 }
 0x6da   : > { %v2881_v32 = vcombine.low %v2699_v36, %v2791_v60  ;;  %v2882_v1 = vcombine.high %v2699_v36, %v2791_v60  ;;  %v4178_v2 = vpop.f32.mrb[41].mxu1 }
 0x6db   : > { %v2794_v54 = vpop.f32.mrb[42].mxu1  ;;  %v4427_v2 = vld [vmem:[#allocation11] sm:$0xff] }
 0x6dc   : > { %v2889_v5 = vrot.slane %v2881_v32, %v5164_v19  ;;  %v2896_v8 = vrot.slane %v2882_v1, %v5164_v19  ;;  %v4179_v0 = vpop.f32.mrb[43].mxu1 }
 0x6dd   : > { %v4347_v0 = vld [vmem:[%s5013_s18] ss:$8 sps:$4 sm:$0xff]  }
 0x6de   : > { %v2897_v63 = vcombine.low %v2873_v55, %v2889_v5  ;;  %v2898_v42 = vcombine.high %v2873_v55, %v2889_v5  ;;  %v2913_v43 = vcombine.low %v2880_v3, %v2896_v8  ;;  %v2914_v12 = vcombine.high %v2880_v3, %v2896_v8  ;;  %v4428_v5 = vld [vmem:[#allocation11 + $0x8] sm:$0xff] }
 0x6e0   : > { %v2905_v13 = vrot.slane %v2897_v63, %v5167_v26  ;;  %v2912_v14 = vrot.slane %v2898_v42, %v5167_v26  ;;  %v2921_v18 = vrot.slane %v2913_v43, %v5167_v26  ;;  %v2928_v52 = vrot.slane %v2914_v12, %v5167_v26  ;;  %v4349_v63 = vld [vmem:[%s5013_s18 + $0x4] ss:$8 sps:$4 sm:$0xff]   ;;  %v4352_v42 = vld [vmem:[%s5013_s18 + $0x14] ss:$8 sps:$4 sm:$0xff]   ;;  %v4350_v43 = vld [vmem:[%s5013_s18 + $0x10] ss:$8 sps:$4 sm:$0xff]  }
 0x6e1   : > { %3365 = vmatprep.subr.bf16.mxu1 %v4349_v63 }
 0x6e2   : > { %v3001_v53 = vcombine.low %v2905_v13, %v2912_v14  ;;  %v3935_v21 = vcombine.high %v2905_v13, %v2912_v14  ;;  %v3017_v22 = vcombine.low %v2921_v18, %v2928_v52  ;;  %v3936_v25 = vcombine.high %v2921_v18, %v2928_v52  ;;  %3366 = vmatpush1.bf16.msra.mxu1 %v4347_v0 }
 0x6e3   : > { %3367 = vmatprep.subr.bf16.mxu1 %v4352_v42 }
 0x6e4   : > { %v3008_v24 = vrot.slane %v3001_v53, %v5164_v19  ;;  %v3016_v9 = vrot.slane %v3935_v21, %v5164_v19  ;;  %v3024_v39 = vrot.slane %v3017_v22, %v5164_v19  ;;  %v3032_v40 = vrot.slane %v3936_v25, %v5164_v19  ;;  %v4355_v25 = vld [vmem:[%s5013_s18 + $0x24] ss:$8 sps:$4 sm:$0xff]  }
 0x6e6   : > { %v3034_v44 = vcombine.high %v3008_v24, %v3016_v9  ;;  %v3050_v41 = vcombine.high %v3024_v39, %v3032_v40  ;;  %v3033_v15 = vcombine.low %v3008_v24, %v3016_v9  ;;  %v3049_v58 = vcombine.low %v3024_v39, %v3032_v40  ;;  %3368 = vmatpush1.bf16.msra.mxu1 %v4350_v43  ;;  %v4358_v24 = vld [vmem:[%s5013_s18 + $0x34] ss:$8 sps:$4 sm:$0xff]   ;;  %v4356_v9 = vld [vmem:[%s5013_s18 + $0x30] ss:$8 sps:$4 sm:$0xff]   ;;  %v4359_v39 = vld [vmem:[%s5013_s18 + $0x40] ss:$8 sps:$4 sm:$0xff]  }
 0x6e7   : > { %3369 = vmatprep.subr.bf16.mxu1 %v4355_v25  ;;  %v4361_v40 = vld [vmem:[%s5013_s18 + $0x44] ss:$8 sps:$4 sm:$0xff]  }
 0x6e8   : > { %v3048_v62 = vrot.slane %v3034_v44, %v5167_v26  ;;  %v3064_v27 = vrot.slane %v3050_v41, %v5167_v26  ;;  %v3041_v61 = vrot.slane %v3033_v15, %v5167_v26  ;;  %v3057_v28 = vrot.slane %v3049_v58, %v5167_v26  ;;  %v4364_v44 = vld [vmem:[%s5013_s18 + $0x54] ss:$8 sps:$4 sm:$0xff]   ;;  %v4362_v41 = vld [vmem:[%s5013_s18 + $0x50] ss:$8 sps:$4 sm:$0xff]   ;;  %v4367_v15 = vld [vmem:[%s5013_s18 + $0x64] ss:$8 sps:$4 sm:$0xff]  }
 0x6e9   : > { %v4365_v58 = vld [vmem:[%s5013_s18 + $0x60] ss:$8 sps:$4 sm:$0xff]  }
 0x6ea   : > { %v3067_v47 = vcombine.low %v3048_v62, %v3064_v27  ;;  %v3066_v7 = vcombine.high %v3041_v61, %v3057_v28  ;;  %v3065_v35 = vcombine.low %v3041_v61, %v3057_v28  ;;  %v3068_v19 = vcombine.high %v3048_v62, %v3064_v27  ;;  %3370 = vmatpush1.bf16.msra.mxu1 %v4353_v23  ;;  %v4370_v62 = vld [vmem:[%s5013_s18 + $0x74] ss:$8 sps:$4 sm:$0xff]   ;;  %v4371_v27 = vld [vmem:[%s5059_s8 + $0x40] sm:$0xff]   ;;  %v4373_v28 = vld [vmem:[%s5059_s8 + $0x48] sm:$0xff]  }
 0x6eb   : > { %3371 = vmatprep.subr.bf16.mxu1 %v4358_v24  ;;  %v4372_v61 = vld [vmem:[%s5059_s8] sm:$0xff]   ;;  %4042 = vmatprep.subr.bf16.mxu0 %v4371_v27 }
 0x6ec   : > { %v4297_v36 = vpack.i.bf16 %v3067_v47, %v2999_v10  ;;  %v4292_v37 = vpack.i.bf16 %v3066_v7, %v2998_v11  ;;  %v4302_v38 = vpack.i.bf16 %v3068_v19, %v3000_v50  ;;  %v4374_v47 = vld [vmem:[%s5059_s8 + $0x8] sm:$0xff]   ;;  %v4375_v7 = vld [vmem:[%s5059_s8 + $0x50] sm:$0xff]   ;;  %v4377_v19 = vld [vmem:[%s5059_s8 + $0x58] sm:$0xff]  }
 0x6ee   : > { %4298 = vrot.lane.b32.xlu1 %v4297_v36, %s4669_s15  ;;  %4293 = vrot.lane.b32.xlu0 %v4292_v37, %s4671_s9  ;;  %v4378_v36 = vld [vmem:[%s5059_s8 + $0x18] sm:$0xff]   ;;  %v4379_v37 = vld [vmem:[%s5059_s8 + $0x60] sm:$0xff]  }
 0x6ef   : > { %3372 = vmatpush1.bf16.msra.mxu1 %v4356_v9 }
 0x6f0   : > { %3373 = vmatprep.subr.bf16.mxu1 %v4361_v40 }
 0x6f2   : > { %4303 = vrot.lane.b32.xlu1 %v4302_v38, %s4670_s29  ;;  %v4380_v38 = vld [vmem:[%s5059_s8 + $0x20] sm:$0xff]  }
 0x6f3   : > { %3374 = vmatpush1.bf16.msra.mxu1 %v4359_v39  ;;  %v3980_v39 = vld [vmem:[%s747_s17] ss:$0 sm:$0xff] }
 0x6f4   : > { %3375 = vmatprep.subr.bf16.mxu1 %v4364_v44 }
 0x6f7   : > { %3376 = vmatpush1.bf16.msra.mxu1 %v4362_v41 }
 0x6f8   : > { %3377 = vmatprep.subr.bf16.mxu1 %v4367_v15 }
 0x6fb   : > { %3378 = vmatpush1.bf16.msra.mxu1 %v4365_v58 }
 0x6fc   : > { %3379 = vmatprep.subr.bf16.mxu1 %v4370_v62 }
 0x6ff   : > { %3380 = vmatpush1.bf16.msra.mxu1 %v4368_v29 }
 0x760   : > { %v4299_v6 = vpop.permute.xlu1 %4298  ;;  %v4294_v16 = vpop.permute.xlu0 %4293 }
 0x761   : > { %v4296_v20 = vunpack.i.h.bf16 %v4294_v16  ;;  %v4295_v17 = vunpack.i.l.bf16 %v4294_v16  ;;  %v4301_v26 = vunpack.i.h.bf16 %v4299_v6  ;;  %v4300_v4 = vunpack.i.l.bf16 %v4299_v6  ;;  %v4381_v6 = vld [vmem:[%s5059_s8 + $0x68] sm:$0xff]  }
 0x763   : > { %v3093_v10 = vsel %vm1954_vm1, %v2997_v34, %v4295_v17  ;;  %v3094_v11 = vsel %vm1954_vm1, %v3065_v35, %v4296_v20  ;;  %v4376_v35 = vld [vmem:[%s5059_s8 + $0x10] sm:$0xff]  }
 0x764   : > { %v4304_v50 = vpop.permute.xlu1 %4303  ;;  %v3096_v48 = vsel %vm3095_vm4, %v3093_v10, %v4300_v4  ;;  %v3097_v51 = vsel %vm3095_vm4, %v3094_v11, %v4301_v26 }
 0x765   : > { %v4306_v45 = vunpack.i.h.bf16 %v4304_v50  ;;  %v4305_v46 = vunpack.i.l.bf16 %v4304_v50 }
 0x767   : > { %v3099_v49 = vsel %vm3098_vm5, %v3096_v48, %v4305_v46  ;;  %v3100_v31 = vsel %vm3098_vm5, %v3097_v51, %v4306_v45  ;;  %v3946_v45 = vld [vmem:[%s737_s23] ss:$0 sm:$0xff] }
 0x768   : > { %v3101_v60 = vpack.c.bf16 %v3100_v31, %v3099_v49  ;;  %v3947_v49 = vld [vmem:[%s740_s16] ss:$0 sm:$0xff] }
 0x76a   : > { %4197 = vmatmul.mubr.bf16.vlgmr.msra.gmra.mrb[28].mxu0 %v3101_v60 }
 0x76b   : > { %4043 = vmatpush3.bf16.msra.mxu0 %v4372_v61 }
 0x76c   : > { %4044 = vmatprep.subr.bf16.mxu0 %v4373_v28 }
 0x76f   : > { %4045 = vmatpush3.bf16.msra.mxu0 %v4374_v47 }
 0x770   : > { %4046 = vmatprep.subr.bf16.mxu0 %v4375_v7 }
 0x773   : > { %4047 = vmatpush3.bf16.msra.mxu0 %v4376_v35 }
 0x774   : > { %4048 = vmatprep.subr.bf16.mxu0 %v4377_v19 }
 0x777   : > { %4049 = vmatpush3.bf16.msra.mxu0 %v4378_v36 }
 0x778   : > { %4050 = vmatprep.subr.bf16.mxu0 %v4379_v37 }
 0x77b   : > { %4051 = vmatpush3.bf16.msra.mxu0 %v4380_v38 }
 0x77c   : > { %4052 = vmatprep.subr.bf16.mxu0 %v4381_v6 }
 0x83d   : > { %v3207_v33 = vpop.f32.mrb[28].mxu0 }
 0x83e   : > { %v3208_v34 = vadd.f32 %v3937_v30, %v3207_v33  ;;  %v4198_v32 = vpop.f32.mrb[29].mxu0 }
 0x83f   : > { %v3210_v1 = vpop.f32.mrb[30].mxu0  ;;  %v4383_v32 = vld [vmem:[%s5059_s8 + $0x70] sm:$0xff]  }
 0x840   : > { %v5554_v54 = vadd.f32 %v4427_v2, %v3208_v34  ;;  %v3211_v55 = vadd.f32 %v3937_v30, %v3210_v1  ;;  %v4199_v3 = vpop.f32.mrb[31].mxu0  ;;  %v4382_v34 = vld [vmem:[%s5059_s8 + $0x28] sm:$0xff]   ;;  %v4384_v1 = vld [vmem:[%s5059_s8 + $0x30] sm:$0xff]   ;;  %v4385_v2 = vld [vmem:[%s5059_s8 + $0x78] sm:$0xff]  }
 0x841   : > { %4053 = vmatpush3.bf16.msra.mxu0 %v4382_v34  ;;  %v3273_v3 = vld [vmem:[%s5053_s11] sm:$0x3] }
 0x842   : > { %v5556_v8 = vadd.f32 %v4428_v5, %v3211_v55  ;;  %3218 = vadd.xlane.f32.xlu1 %v5554_v54  ;;  %4054 = vmatprep.subr.bf16.mxu0 %v4383_v32  ;;  %v4386_v55 = vld [vmem:[%s5059_s8 + $0x38] sm:$0xff]   ;;  %v3278_v5 = vrot.slane %v3273_v3, %v837_v59  ;;  %v3282_v0 = vrot.slane %v3273_v3, %v841_v57 }
 0x844   : > { %3220 = vadd.xlane.f32.xlu0 %v5556_v8 }
 0x845   : > { %4055 = vmatpush3.bf16.msra.mxu0 %v4384_v1 }
 0x846   : > { %4056 = vmatprep.subr.bf16.mxu0 %v4385_v2 }
 0x849   : > { %4057 = vmatpush3.bf16.msra.mxu0 %v4386_v55 }
 0x8cf   : > { %v3219_v12 = vpop.xlane.xlu1 %3218 }
 0x8d0   : > { %v3222_v13 = vmul.f32 0.0078125, %v3219_v12 }
 0x8d1   : > { %v3221_v14 = vpop.xlane.xlu0 %3220 }
 0x8d2   : > { %v3224_v18 = vsub.f32 %v5554_v54, %v3222_v13  ;;  %v3223_v52 = vmul.f32 0.0078125, %v3221_v14 }
 0x8d4   : > { %v5566_v53 = vsub.f32 %v5556_v8, %v3223_v52  ;;  %v3226_v21 = vmul.f32 %v3224_v18, %v3224_v18 }
 0x8d6   : > { %3228 = vadd.xlane.f32.xlu0 %v3226_v21  ;;  %v3227_v22 = vmul.f32 %v5566_v53, %v5566_v53 }
 0x8da   : > { %3230 = vadd.xlane.f32.xlu0 %v3227_v22 }
 0x963   : > { %v3229_v16 = vpop.xlane.xlu0 %3228 }
 0x964   : > { %v3232_v20 = vmul.f32 0.0078125, %v3229_v16 }
 0x966   : > { %v3234_v17 = vadd.f32 1e-05, %v3232_v20 }
 0x967   : > { %v3231_v26 = vpop.xlane.xlu0 %3230 }
 0x968   : > { %4423 = vrsqrt.f32 %v3234_v17  ;;  %v3233_v4 = vmul.f32 0.0078125, %v3231_v26 }
 0x96a   : > { %v3235_v10 = vadd.f32 1e-05, %v3233_v4 }
 0x96c   : > { %4425 = vrsqrt.f32 %v3235_v10 }
 0x972   : > { %v4424_v11 = vpop.eup %4423 }
 0x973   : > { %v3238_v50 = vmul.f32 %v4424_v11, %v3224_v18 }
 0x975   : > { %v3246_v51 = vmul.f32 %v3946_v45, %v3238_v50 }
 0x976   : > { %v4426_v46 = vpop.eup %4425 }
 0x977   : > { %v3239_v48 = vmul.f32 %v4426_v46, %v5566_v53  ;;  %v3254_v60 = vadd.f32 %v3947_v49, %v3246_v51 }
 0x979   : > { %v3247_v31 = vmul.f32 %v3946_v45, %v3239_v48 }
 0x97b   : > { %v3255_v30 = vadd.f32 %v3947_v49, %v3247_v31 }
 0x97d   : > { %v3256_v33 = vpack.c.bf16 %v3255_v30, %v3254_v60 }
 0x97f   : > { %3398 = vmatmul.mubr.bf16.vlgmr.msra.gmra.mrb[44].mxu1 %v3256_v33 }
 0xa52   : > { %v3399_v63 = vpop.f32.mrb[44].mxu1 }
 0xa53   : > { %v3400_v42 = vadd.f32 %v3399_v63, %v3278_v5  ;;  %v3401_v43 = vpop.f32.mrb[45].mxu1 }
 0xa54   : > { %v3402_v12 = vadd.f32 %v3401_v43, %v3282_v0  ;;  %v3403_v13 = vpop.f32.mrb[46].mxu1 }
 0xa55   : > { %v3404_v14 = vadd.f32 %v3403_v13, %v3278_v5  ;;  %v3405_v18 = vpop.f32.mrb[47].mxu1  ;;  %v3408_v53 = vmax.f32 %v3400_v42, 0.0 }
 0xa56   : > { %v3406_v52 = vadd.f32 %v3405_v18, %v3282_v0  ;;  %v3409_v22 = vmax.f32 %v3402_v12, 0.0 }
 0xa57   : > { %v3410_v21 = vmax.f32 %v3404_v14, 0.0 }
 0xa58   : > { %v3411_v25 = vmax.f32 %v3406_v52, 0.0 }
 0xa59   : > { %v3412_v23 = vpack.c.bf16 %v3410_v21, %v3408_v53 }
 0xa5a   : > { %v3413_v24 = vpack.c.bf16 %v3411_v25, %v3409_v22 }
 0xa5c   : > { %3574 = vmatprep.mubr.bf16.mxu0 %v3413_v24 }
 0xa5d   : > { %3575 = vmatmul.mubr.bf16.vlgmr.msra.gmra.mrb[32].mxu0 %v3412_v23 }
 0xb30   : > { %v4058_v59 = vpop.f32.mrb[32].mxu0 }
 0xb31   : > { %v4059_v56 = vpop.f32.mrb[33].mxu0 }
 0xb32   : > { %v4060_v57 = vadd.f32 %v4059_v56, %v4058_v59  ;;  %v4061_v9 = vpop.f32.mrb[34].mxu0  ;;  %3597 = sbr.rel (%p3981_p11) target bundleno = 2875 (0xb3b), region = 108 }
 0xb33   : > { %v4062_v40 = vpop.f32.mrb[35].mxu0 }
 0xb34   : > { %v3583_v44 = vadd.f32 %v4060_v57, %v5554_v54  ;;  %v4063_v41 = vadd.f32 %v4062_v40, %v4061_v9 }
 0xb36   : > { %v3592_v15 = vadd.f32 %v3980_v39, %v3583_v44  ;;  %v3584_v58 = vadd.f32 %v4063_v41, %v5556_v8 }
 0xb38   : > { %v3593_v62 = vadd.f32 %v3980_v39, %v3584_v58  ;;  %3598 = vst [vmem:[#allocation11] sm:$0xff] (!%p3981_p11), %v3592_v15 }
 0xb3a   : > { %3599 = vst [vmem:[#allocation11 + $0x8] sm:$0xff] %v3593_v62 }
 0xb3b PF: > { %p3982_p8 = scmp.ne.s32.totalorder %s4893_s22, 1 }
 0xb3c   : > { %3606 = vadd.xlane.f32.xlu0 (!%p3982_p8), %v3592_v15  ;;  %s5740_s17 = sld [smem:[#allocation28_spill]] (!%p3982_p8)  ;;  %s5741_s3 = sld [smem:[#allocation29_spill]] (!%p3982_p8) }
 0xb3d   : > { %3603 = sbr.rel (%p3982_p8) target bundleno = 3192 (0xc78), region = 112 }
 0xb40   : > { %3608 = vadd.xlane.f32.xlu0 (!%p3982_p8), %v3593_v62 }
 0xb42   : > { %v3983_v20 = vld [vmem:[%s5740_s17] ss:$0 sm:$0xff] (!%p3982_p8) }
 0xb43   : > { %v3984_v26 = vld [vmem:[%s5741_s3] ss:$0 sm:$0xff] (!%p3982_p8) }
 0xbc9   : > { %v3607_v27 = vpop.xlane.xlu0 %3606 }
 0xbca   : > { %v3610_v61 = vmul.f32 0.0078125, %v3607_v27 }
 0xbcc   : > { %v3612_v28 = vsub.f32 %v3592_v15, %v3610_v61 }
 0xbcd   : > { %v3609_v54 = vpop.xlane.xlu0 %3608 }
 0xbce   : > { %v3611_v29 = vmul.f32 0.0078125, %v3609_v54  ;;  %v3614_v47 = vmul.f32 %v3612_v28, %v3612_v28 }
 0xbd0   : > { %v3613_v7 = vsub.f32 %v3593_v62, %v3611_v29  ;;  %3616 = vadd.xlane.f32.xlu1 %v3614_v47 }
 0xbd2   : > { %v3615_v8 = vmul.f32 %v3613_v7, %v3613_v7 }
 0xbd4   : > { %3618 = vadd.xlane.f32.xlu1 %v3615_v8 }
 0xc5d   : > { %v3617_v35 = vpop.xlane.xlu1 %3616 }
 0xc5e   : > { %v3620_v19 = vmul.f32 0.0078125, %v3617_v35 }
 0xc60   : > { %v3622_v36 = vadd.f32 1e-05, %v3620_v19 }
 0xc61   : > { %v3619_v37 = vpop.xlane.xlu1 %3618 }
 0xc62   : > { %4429 = vrsqrt.f32 %v3622_v36  ;;  %v3621_v38 = vmul.f32 0.0078125, %v3619_v37 }
 0xc64   : > { %v3623_v6 = vadd.f32 1e-05, %v3621_v38 }
 0xc66   : > { %4431 = vrsqrt.f32 %v3623_v6 }
 0xc6c   : > { %v4430_v16 = vpop.eup %4429 }
 0xc6d   : > { %v3626_v17 = vmul.f32 %v4430_v16, %v3612_v28 }
 0xc6f   : > { %v3634_v4 = vmul.f32 %v3983_v20, %v3626_v17 }
 0xc70   : > { %v4432_v10 = vpop.eup %4431 }
 0xc71   : > { %v3642_v11 = vadd.f32 %v3984_v26, %v3634_v4  ;;  %v3627_v50 = vmul.f32 %v4432_v10, %v3613_v7 }
 0xc73   : > { %3644 = vst [vmem:[#allocation11] sm:$0xff] %v3642_v11  ;;  %v3635_v45 = vmul.f32 %v3983_v20, %v3627_v50 }
 0xc75   : > { %v3643_v46 = vadd.f32 %v3984_v26, %v3635_v45 }
 0xc77   : > { %3645 = vst [vmem:[#allocation11 + $0x8] sm:$0xff] %v3643_v46 }
 0xc78 PF: > { %p4240_p6 = scmp.eq.s32.totalorder %s4893_s22, 1  ;;  %s4674_s25 = smov [#allocation11]  }
 0xc79   : > { %s3652_s1 = sshll.u32 %s4674_s25, 4  ;;  %s3653_s1 = int_to_ptr.vmem [resolvable:$true] %s3652_s1 }
 0xc7a   : > { %s4581_s13 = scalar_lea.vmem %s3653_s1, 256  ;;  %p4588_p1 = scmp.lt.s32.totalorder %s3653_s1, %s3653_s1 }
 0xc7b   : > { %p4582_p7 = scmp.ne.s32.totalorder %s3653_s1, %s4581_s13  ;;  %p4589_p13 = scmp.lt.s32.totalorder %s4581_s13, %s4581_s13 }
 0xc7d   : > { %p4583_p2 = pnand %p4582_p7, %p4240_p6  ;;  %p4590_p12 = por %p4589_p13, %p4588_p1 }
 0xc7f   : > { %p4584_p10 = pneg %p4583_p2 }
 0xc81   : > { %p4591_p0 = pnand %p4590_p12, %p4584_p10 }
 0xc83   : > { %4594 = shalt.err (!%p4591_p0)
}
 0xc84   : > { %s5742_s29 = sld [smem:[#allocation30_spill]] }
 0xc8a   : > { %s4595_s9 = scalar_lea.hbm %s5742_s29, 256 }
 0xc8b   : > { %p4596_p9 = scmp.ne.s32.totalorder %s5742_s29, %s4595_s9  ;;  %p4601_p4 = scmp.lt.u32.totalorder %s4595_s9, %s5742_s29 }
 0xc8d   : > { %p4597_p3 = pnand %p4596_p9, %p4240_p6 }
 0xc8f   : > { %p4598_p5 = pneg %p4597_p3 }
 0xc91   : > { %p4603_p11 = pnand %p4601_p4, %p4598_p5 }
 0xc93   : > { %4606 = shalt.err (!%p4603_p11)
}
 0xc94   : > { %s4675_s30 = smov 128   ;;  %s4676_s21 = smov 8  }
 0xc95   : > { %4217 = dma.vmem_to_hbm [thread:$0]  (%p4240_p6), %s3653_s1, 256, %s5742_s29, [#allocation4], %s4675_s30, %s4675_s30, %s4676_s21  }
 0xc96   : > { %4636 = dma.done.wait (%p4240_p6), [#allocation4], 256  }
 0xc97   : > { %4638 = vsyncadd (%p4240_p6), [#allocation4], 4294967040 }
 0xc98 PF: > { %s5743_s21 = sld [smem:[#allocation17_spill]]  ;;  %s5744_s10 = sld [smem:[#allocation16_spill]] }
 0xc99   : > { %s5745_s20 = sld [smem:[#allocation18_spill]]  ;;  %s5746_s18 = smov %s4645_s19 }
 0xc9e   : > { %p30_p8 = scmp.ge.s32.totalorder %s5743_s21, 4   ;;  %s5747_s19 = smov %s5744_s10 }
 0xca0   :  { %32 = sbr.rel (!%p30_p8) target bundleno = 20 (0x14), region = 193 }
 0xca7   :  { %3668 = vsyncpa [#allocation3], 1 }
 0xca8   :  { %3670 = vsyncpa [#allocation3 + $0x1], 1 }
 0xca9   :  { %3671 = vsyncpa [#allocation6], 1 }
 0xcaa   :  { %3673 = vsyncpa [#allocation6 + $0x1], 1 }
 0xcab   :  { %3674 = vsyncpa [#allocation9], 1 }
 0xcac   :  { %3676 = vsyncpa [#allocation9 + $0x1], 1 }
 0xcad   :  { %3677 = vsyncpa [#allocation4], 1 }
 0xcae   :  { %3679 = vsyncpa [#allocation4 + $0x1], 1 }

</bundles_post_ra>
